<compile_context>
chip_gen: v7x
topology: tpu7x:2x2x1
jax: 0.10.0
libtpu: 0.0.40
codegen_flags: <defaults>
</compile_context>

<pallas_src>
import functools

import jax
import jax.numpy as jnp
from jax import lax
from jax.experimental import pallas as pl
from jax.experimental.pallas import tpu as pltpu


def _round_up(v, m):
    return (v + m - 1) // m * m


def _padded_tile_bytes(rows, cols, dtype):
    """VMEM bytes of a (rows, cols) buffer after (sublane, lane) tile padding."""
    itemsize = jnp.dtype(dtype).itemsize
    sublane = 8 * max(1, 4 // itemsize)          # f32: 8, bf16: 16, int8: 32
    return _round_up(max(rows, 1), sublane) * _round_up(max(cols, 1), 128) * itemsize


def _temporal_attention_kernel(x_ref, w_ref, b_ref, o_ref, kv_scr,
                               *, c, c8, tq, hw_real, approx):
    """One (batch, query-tile) grid step.

    x_ref : (1, C, HWp)   channel-major input block, resident for the whole batch element
    w_ref : (2*C8+C, C)   fused [wq; wk; wv] 1x1-conv weights (channel-major, no transpose)
    b_ref : (2*C8+C, 1)   fused biases
    o_ref : (1, C, TQ)    channel-major output tile (lane-dense)
    kv_scr: (C8+C+1, HWp) per-batch cache: rows [0,C8)=k, [C8,C8+C)=v, last row = 1.0
    """
    qi = pl.program_id(1)
    hw = x_ref.shape[2]                            # padded HW (static)

    # ---- once per batch element: channel-major k/v projection, cached in VMEM ----
    @pl.when(qi == 0)
    def _project_kv():
        x_full = x_ref[0]                                               # (C, HWp)
        w_kv = w_ref[pl.ds(c8, c8 + c), :]                              # (C8+C, C)
        b_kv = b_ref[pl.ds(c8, c8 + c), :]                              # (C8+C, 1)
        kv = lax.dot_general(w_kv, x_full, (((1,), (0,)), ((), ())),
                             preferred_element_type=jnp.float32) + b_kv
        kv_scr[pl.ds(0, c8 + c), :] = kv.astype(kv_scr.dtype)
        # Trailing ones row: makes the second matmul emit the softmax denominator too.
        kv_scr[pl.ds(c8 + c, 1), :] = jnp.ones((1, hw), kv_scr.dtype)

    # ---- per query tile: q projection -> scores -> softmax -> value aggregation ----
    row0 = pl.multiple_of(qi * tq, tq)
    x_tile = x_ref[0, :, pl.ds(row0, tq)]                               # (C, TQ)
    w_q = w_ref[pl.ds(0, c8), :]                                        # (C8, C)
    b_q = b_ref[pl.ds(0, c8), :]                                        # (C8, 1)
    q_cm = lax.dot_general(w_q, x_tile, (((1,), (0,)), ((), ())),
                           preferred_element_type=jnp.float32) + b_q    # (C8, TQ)
    q_tok = jnp.transpose(q_cm).astype(kv_scr.dtype)                    # (TQ, C8), tiny

    k = kv_scr[pl.ds(0, c8), :]                                         # (C8, HWp)
    s = jnp.dot(q_tok, k, preferred_element_type=jnp.float32)           # (TQ, HWp)

    if hw != hw_real:                              # static: mask zero-padded key columns
        col = lax.broadcasted_iota(jnp.int32, (tq, hw), 1)
        s = jnp.where(col < hw_real, s, -1e30)

    s = s - jnp.max(s, axis=-1, keepdims=True)
    p = jnp.exp(s)                                                      # un-normalised probs

    v1 = kv_scr[pl.ds(c8, c + 1), :]                                    # (C+1, HWp): v + ones row
    out_aug = lax.dot_general(v1, p.astype(kv_scr.dtype),
                              (((1,), (1,)), ((), ())),
                              preferred_element_type=jnp.float32)       # (C+1, TQ)
    inv = pl.reciprocal(out_aug[c:c + 1, :], approx=approx)             # (1, TQ): 1/denominator
    o_ref[0] = (out_aug[:c, :] * inv).astype(o_ref.dtype)


def temporal_attention(x_nchw, wq, bq, wk, bk, wv, bv, *,
                       tq=None, compute_dtype=None, approx_softmax=None):
    """TemporalAttention forward.  x_nchw: (B, C, H, W); wq/wk: (C//8, C); wv: (C, C)."""
    b, c, h, w = x_nchw.shape
    c8 = wq.shape[0]
    hw = h * w
    o = 2 * c8 + c
    out_dtype = x_nchw.dtype

    on_tpu = jax.default_backend() == "tpu"
    if compute_dtype is None:
        # bf16 MXU inputs (f32 accumulation) on TPU; plain f32 elsewhere (the CPU dot
        # executor used in interpret-mode sandboxes rejects bf16 x bf16 -> f32).
        compute_dtype = jnp.bfloat16 if on_tpu else jnp.float32
    compute_dtype = jnp.dtype(compute_dtype)
    if approx_softmax is None:
        approx_softmax = on_tpu                   # EUP approx reciprocal only on real TPU

    # ---- generation-aware defaults (VMEM capacity) ----
    vmem_cap = 128 << 20
    if on_tpu:
        try:
            vmem_cap = int(getattr(pltpu.get_tpu_info(), "vmem_capacity_bytes", vmem_cap))
        except Exception:
            pass
    big_vmem = vmem_cap >= (96 << 20)             # v5e/v6e: 128 MiB; v7x: 64 MiB
    if tq is None:
        tq = 256 if big_vmem else 128

    # ---- pad HW up to a lane-dense multiple of 128; pick a query tile dividing it ----
    hw_pad = _round_up(hw, 128)
    tq_eff = max(128, (min(tq, hw_pad) // 128) * 128)
    while hw_pad % tq_eff:
        tq_eff -= 128
    nq = hw_pad // tq_eff

    # Free layout change NCHW -> (B, C, HW); single cast + zero-pad of the token axis.
    x_cn = x_nchw.reshape(b, c, hw).astype(compute_dtype)
    if hw_pad != hw:
        x_cn = jnp.pad(x_cn, ((0, 0), (0, 0), (0, hw_pad - hw)))

    # Fused channel-major projection weights [wq; wk; wv] (no transpose) + fused bias.
    w_all = jnp.concatenate([wq, wk, wv], axis=0).astype(compute_dtype)      # (O, C)
    b_all = jnp.concatenate([bq, bk, bv], axis=0).reshape(o, 1).astype(jnp.float32)

    # ---- padding-aware VMEM budget, capped per generation ----
    est = (2 * _padded_tile_bytes(c, hw_pad, compute_dtype)         # x block (x2 buffers)
           + 2 * _padded_tile_bytes(c, tq_eff, out_dtype)           # out block (x2)
           + 2 * _padded_tile_bytes(o, c, compute_dtype)            # fused weights (x2)
           + 2 * _padded_tile_bytes(o, 1, jnp.float32)              # fused bias (x2)
           + _padded_tile_bytes(c8 + c + 1, hw_pad, compute_dtype)  # k/v(+ones) scratch
           + 3 * _padded_tile_bytes(tq_eff, hw_pad, jnp.float32)    # live f32 score/exp
           + _padded_tile_bytes(c8 + c, hw_pad, jnp.float32)        # qi==0 projection tmp
           + 2 * _padded_tile_bytes(c + 1, tq_eff, jnp.float32))    # out_aug / scaled out
    vmem_ceiling = (100 << 20) if big_vmem else (48 << 20)
    vmem_limit = int(min(max(int(est * 1.4), 32 << 20), vmem_ceiling))

    kernel = functools.partial(_temporal_attention_kernel,
                               c=c, c8=c8, tq=tq_eff, hw_real=hw, approx=approx_softmax)

    out_cn = pl.pallas_call(
        kernel,
        out_shape=jax.ShapeDtypeStruct((b, c, hw_pad), out_dtype),
        grid_spec=pltpu.PrefetchScalarGridSpec(
            num_scalar_prefetch=0,
            grid=(b, nq),
            in_specs=[
                # x: resident across the whole query-tile axis of one batch element.
                # TODO(synk): pipeline_mode=pl.Buffered(3) here (v5e/v6e) would hide the
                # next batch's x DMA behind more than one query tile.
                pl.BlockSpec((1, c, hw_pad), lambda i, j: (i, 0, 0)),
                # Constant fused weights / bias.
                # TODO(synk): pipeline_mode=pl.Buffered(1) on these constant specs would
                # drop their redundant second VMEM buffer (~O*C*itemsize).
                pl.BlockSpec((o, c), lambda i, j: (0, 0)),
                pl.BlockSpec((o, 1), lambda i, j: (0, 0)),
            ],
            out_specs=pl.BlockSpec((1, c, tq_eff), lambda i, j: (i, 0, j)),
            scratch_shapes=[
                pltpu.VMEM((c8 + c + 1, hw_pad), compute_dtype),    # k rows, v rows, ones row
            ],
        ),
        compiler_params=pltpu.CompilerParams(
            # Batch axis -> megacore; the query-tile axis must stay sequential because
            # the per-batch k/v scratch cache is carried across it.
            # TODO(synk): for B == 1 on v7x (2 TensorCores), precompute k/v in a separate
            # pallas_call so the query-tile axis can also be marked "parallel".
            dimension_semantics=("parallel", "arbitrary"),
            vmem_limit_bytes=vmem_limit),
    )(x_cn, w_all, b_all)

    if hw_pad != hw:
        out_cn = out_cn[:, :, :hw]
    return out_cn.reshape(b, c, h, w)


def temporal_attention_ref(x_nchw, wq, bq, wk, bk, wv, bv):
    """Pure-JAX reference mirroring the PyTorch forward exactly (f32, high precision)."""
    b, c, h, w = x_nchw.shape
    hw = h * w
    hi = lax.Precision.HIGHEST
    x = x_nchw.reshape(b, c, hw)                                        # (B, C, HW)
    q = jnp.einsum('oc,bcn->bon', wq, x, precision=hi) + bq[None, :, None]
    k = jnp.einsum('oc,bcn->bon', wk, x, precision=hi) + bk[None, :, None]
    v = jnp.einsum('oc,bcn->bon', wv, x, precision=hi) + bv[None, :, None]
    attn = jnp.einsum('bcn,bcm->bnm', q, k, precision=hi)               # (B, HW, HW)
    attn = jax.nn.softmax(attn, axis=-1)
    out = jnp.einsum('bcm,bnm->bcn', v, attn, precision=hi)             # (B, C, HW)
    return out.reshape(b, c, h, w)


if __name__ == "__main__":
    def _make_inputs(key, b, c, h, w, scale=0.04):
        c8 = c // 8
        kx, kq, kbq, kk, kbk, kv, kbv = jax.random.split(key, 7)
        x = jax.random.normal(kx, (b, c, h, w), dtype=jnp.float32)
        wq = jax.random.normal(kq, (c8, c), dtype=jnp.float32) * scale
        bq = jax.random.normal(kbq, (c8,), dtype=jnp.float32) * scale
        wk = jax.random.normal(kk, (c8, c), dtype=jnp.float32) * scale
        bk = jax.random.normal(kbk, (c8,), dtype=jnp.float32) * scale
        wv = jax.random.normal(kv, (c, c), dtype=jnp.float32) * scale
        bv = jax.random.normal(kbv, (c,), dtype=jnp.float32) * scale
        return x, wq, bq, wk, bk, wv, bv

    key = jax.random.PRNGKey(0)
    k1, k2 = jax.random.split(key)

    # 1) Lane-friendly shapes exercising query tiling (HW = 256 -> 2 tiles of 128).
    args1 = _make_inputs(k1, 2, 128, 16, 16)
    ref1 = temporal_attention_ref(*args1)
    out1 = temporal_attention(*args1, tq=128,
                              compute_dtype=jnp.float32, approx_softmax=False)
    out1 = jax.block_until_ready(out1)
    assert out1.shape == ref1.shape
    assert jnp.allclose(out1, ref1, atol=2e-3, rtol=2e-3), "f32 kernel mismatch (tiled path)"

    # 2) Non-128-multiple spatial size -> padded / masked-key path (HW = 100 -> 128).
    args2 = _make_inputs(k2, 1, 64, 10, 10)
    ref2 = temporal_attention_ref(*args2)
    out2 = temporal_attention(*args2, compute_dtype=jnp.float32, approx_softmax=False)
    out2 = jax.block_until_ready(out2)
    assert out2.shape == ref2.shape
    assert jnp.allclose(out2, ref2, atol=2e-3, rtol=2e-3), "f32 kernel mismatch (padded path)"

    # 3) Default fast path: bf16 MXU inputs + approximate reciprocal on TPU
    #    (falls back to f32 / exact reciprocal on non-TPU backends).
    out_fast = jax.block_until_ready(temporal_attention(*args1))
    assert out_fast.shape == ref1.shape
    assert jnp.allclose(out_fast, ref1, atol=5e-2, rtol=5e-2), "fast-path kernel mismatch"

    print("KERNEL_OK")
</pallas_src>

<mosaic_0001>
module attributes {stable_mosaic.version = 11 : i64} {
  func.func @_temporal_attention_kernel(%arg0: i32, %arg1: i32, %arg2: memref<1x128x256xf32, #tpu.memory_space<vmem>>, %arg3: memref<160x128xf32, #tpu.memory_space<vmem>>, %arg4: memref<160x1xf32, #tpu.memory_space<vmem>>, %arg5: memref<1x128x128xf32, #tpu.memory_space<vmem>>, %arg6: memref<145x256xf32, #tpu.memory_space<vmem>>) attributes {dimension_semantics = [#tpu.dimension_semantics<parallel>, #tpu.dimension_semantics<arbitrary>], iteration_bounds = array<i64: 2, 2>, scalar_prefetch = 0 : i64, scratch_operands = 1 : i64, tpu.core_type = #tpu.core_type<tc>, window_params = [{transform_indices = @transform_0, window_bounds = array<i64: 1, 128, 256>}, {pipeline_mode = #tpu.pipeline_mode<synchronous>, transform_indices = @transform_1, window_bounds = array<i64: 160, 128>}, {pipeline_mode = #tpu.pipeline_mode<synchronous>, transform_indices = @transform_2, window_bounds = array<i64: 160, 1>}, {transform_indices = @transform_3, window_bounds = array<i64: 1, 128, 128>}]} {
    %c0_i32 = arith.constant 0 : i32
    %0 = arith.cmpi eq, %arg1, %c0_i32 : i32
    %1 = arith.extui %0 : i1 to i32
    %c0_i32_0 = arith.constant 0 : i32
    %2 = arith.cmpi ne, %1, %c0_i32_0 : i32
    scf.if %2 {
      %c0_15 = arith.constant 0 : index
      %c0_16 = arith.constant 0 : index
      %c0_17 = arith.constant 0 : index
      %31 = vector.load %arg2[%c0_15, %c0_16, %c0_17] : memref<1x128x256xf32, #tpu.memory_space<vmem>>, vector<1x128x256xf32>
      %32 = vector.shape_cast %31 : vector<1x128x256xf32> to vector<128x256xf32>
      %c16_18 = arith.constant 16 : index
      %c0_19 = arith.constant 0 : index
      %33 = vector.load %arg3[%c16_18, %c0_19] : memref<160x128xf32, #tpu.memory_space<vmem>>, vector<144x128xf32>
      %c16_20 = arith.constant 16 : index
      %c0_21 = arith.constant 0 : index
      %34 = vector.load %arg4[%c16_20, %c0_21] : memref<160x1xf32, #tpu.memory_space<vmem>>, vector<144x1xf32>
      %cst_22 = arith.constant dense<0.000000e+00> : vector<144x256xf32>
      %35 = tpu.matmul %33, %32, %cst_22 {dimension_numbers = #tpu.dot_dimension_numbers<[1], [0], [0], [1], [0, 0, 1, 1], [], []>} : vector<144x128xf32>, vector<128x256xf32>, vector<144x256xf32> -> vector<144x256xf32>
      %36 = vector.broadcast %34 : vector<144x1xf32> to vector<144x256xf32>
      %37 = arith.addf %35, %36 : vector<144x256xf32>
      %c0_23 = arith.constant 0 : index
      %c0_24 = arith.constant 0 : index
      %38 = vector.load %arg6[%c0_23, %c0_24] : memref<145x256xf32, #tpu.memory_space<vmem>>, vector<144x256xf32>
      tpu.vector_store %arg6[%c0_23, %c0_24], %37 {strides = array<i32>} : memref<145x256xf32, #tpu.memory_space<vmem>>, vector<144x256xf32>,
      %cst_25 = arith.constant 1.000000e+00 : f32
      %39 = vector.broadcast %cst_25 : f32 to vector<1x256xf32>
      %c144 = arith.constant 144 : index
      %c0_26 = arith.constant 0 : index
      %40 = vector.load %arg6[%c144, %c0_26] : memref<145x256xf32, #tpu.memory_space<vmem>>, vector<1x256xf32>
      tpu.vector_store %arg6[%c144, %c0_26], %39 {strides = array<i32>} : memref<145x256xf32, #tpu.memory_space<vmem>>, vector<1x256xf32>,
    } else {
    }
    %c128_i32 = arith.constant 128 : i32
    %3 = arith.muli %arg1, %c128_i32 : i32
    %4 = tpu.assume_multiple %3, 128 : i32
    %c0 = arith.constant 0 : index
    %c0_1 = arith.constant 0 : index
    %5 = arith.index_cast %4 : i32 to index
    %6 = vector.load %arg2[%c0, %c0_1, %5] : memref<1x128x256xf32, #tpu.memory_space<vmem>>, vector<1x128x128xf32>
    %7 = vector.shape_cast %6 : vector<1x128x128xf32> to vector<128x128xf32>
    %c0_2 = arith.constant 0 : index
    %c0_3 = arith.constant 0 : index
    %8 = vector.load %arg3[%c0_2, %c0_3] : memref<160x128xf32, #tpu.memory_space<vmem>>, vector<16x128xf32>
    %c0_4 = arith.constant 0 : index
    %c0_5 = arith.constant 0 : index
    %9 = vector.load %arg4[%c0_4, %c0_5] : memref<160x1xf32, #tpu.memory_space<vmem>>, vector<16x1xf32>
    %cst = arith.constant dense<0.000000e+00> : vector<16x128xf32>
    %10 = tpu.matmul %8, %7, %cst {dimension_numbers = #tpu.dot_dimension_numbers<[1], [0], [0], [1], [0, 0, 1, 1], [], []>} : vector<16x128xf32>, vector<128x128xf32>, vector<16x128xf32> -> vector<16x128xf32>
    %11 = vector.broadcast %9 : vector<16x1xf32> to vector<16x128xf32>
    %12 = arith.addf %10, %11 : vector<16x128xf32>
    %13 = tpu.transpose %12, [1, 0] : vector<16x128xf32> -> vector<128x16xf32>
    %c0_6 = arith.constant 0 : index
    %c0_7 = arith.constant 0 : index
    %14 = vector.load %arg6[%c0_6, %c0_7] : memref<145x256xf32, #tpu.memory_space<vmem>>, vector<16x256xf32>
    %cst_8 = arith.constant dense<0.000000e+00> : vector<128x256xf32>
    %15 = tpu.matmul %13, %14, %cst_8 {dimension_numbers = #tpu.dot_dimension_numbers<[1], [0], [0], [1], [0, 0, 1, 1], [], []>} : vector<128x16xf32>, vector<16x256xf32>, vector<128x256xf32> -> vector<128x256xf32>
    %cst_9 = arith.constant dense<0xFF800000> : vector<128xf32>
    %16 = vector.multi_reduction <maximumf>, %15, %cst_9 [1] : vector<128x256xf32> to vector<128xf32>
    %17 = vector.shape_cast %16 : vector<128xf32> to vector<128x1xf32>
    %18 = vector.broadcast %17 : vector<128x1xf32> to vector<128x256xf32>
    %19 = arith.subf %15, %18 : vector<128x256xf32>
    %20 = math.exp %19 : vector<128x256xf32>
    %c16 = arith.constant 16 : index
    %c0_10 = arith.constant 0 : index
    %21 = vector.load %arg6[%c16, %c0_10] : memref<145x256xf32, #tpu.memory_space<vmem>>, vector<129x256xf32>
    %cst_11 = arith.constant dense<0.000000e+00> : vector<129x128xf32>
    %22 = tpu.matmul %21, %20, %cst_11 {dimension_numbers = #tpu.dot_dimension_numbers<[1], [1], [0], [0], [0, 0, 1, 0], [], []>} : vector<129x256xf32>, vector<128x256xf32>, vector<129x128xf32> -> vector<129x128xf32>
    %23 = vector.extract_strided_slice %22 {offsets = [128, 0], sizes = [1, 128], strides = [1, 1]} : vector<129x128xf32> to vector<1x128xf32>
    %24 = tpu.reciprocal %23 : vector<1x128xf32> -> vector<1x128xf32>
    %25 = vector.extract_strided_slice %22 {offsets = [0, 0], sizes = [128, 128], strides = [1, 1]} : vector<129x128xf32> to vector<128x128xf32>
    %26 = vector.broadcast %24 : vector<1x128xf32> to vector<128x128xf32>
    %27 = arith.mulf %25, %26 : vector<128x128xf32>
    %c0_12 = arith.constant 0 : index
    %c0_13 = arith.constant 0 : index
    %c0_14 = arith.constant 0 : index
    %28 = vector.load %arg5[%c0_12, %c0_13, %c0_14] : memref<1x128x128xf32, #tpu.memory_space<vmem>>, vector<1x128x128xf32>
    %29 = vector.shape_cast %28 : vector<1x128x128xf32> to vector<128x128xf32>
    %30 = vector.shape_cast %27 : vector<128x128xf32> to vector<1x128x128xf32>
    tpu.vector_store %arg5[%c0_12, %c0_13, %c0_14], %30 {strides = array<i32>} : memref<1x128x128xf32, #tpu.memory_space<vmem>>, vector<1x128x128xf32>,
    return
  }
  func.func @transform_0(%arg0: i32, %arg1: i32) -> (i32, i32, i32) {
    %c0_i32 = arith.constant 0 : i32
    %c0_i32_0 = arith.constant 0 : i32
    %c0_i32_1 = arith.constant 0 : i32
    return %arg0, %c0_i32, %c0_i32_0 : i32, i32, i32
  }
  func.func @transform_1(%arg0: i32, %arg1: i32) -> (i32, i32) {
    %c0_i32 = arith.constant 0 : i32
    %c0_i32_0 = arith.constant 0 : i32
    %c0_i32_1 = arith.constant 0 : i32
    return %c0_i32, %c0_i32_0 : i32, i32
  }
  func.func @transform_2(%arg0: i32, %arg1: i32) -> (i32, i32) {
    %c0_i32 = arith.constant 0 : i32
    %c0_i32_0 = arith.constant 0 : i32
    %c0_i32_1 = arith.constant 0 : i32
    return %c0_i32, %c0_i32_0 : i32, i32
  }
  func.func @transform_3(%arg0: i32, %arg1: i32) -> (i32, i32, i32) {
    %c0_i32 = arith.constant 0 : i32
    %c0_i32_0 = arith.constant 0 : i32
    return %arg0, %c0_i32, %arg1 : i32, i32, i32
  }
}

</mosaic_0001>

<bundles_post_ra>
// kernel: tpu_custom_call.1
= control target key start
LH: loop header
LB: loop body
LE: loop exit
PB: predicated region body
PF: predicated region fallthrough
CT: control target
= control target key end

     0   :  { %8 = vsyncpa [#allocation4], 0  ;;  %s2594_s0 = inlined_call_operand.hbm [shape: f32[2,128,256], index: 0, kind: input, shape index: {}]   ;;  %s2595_s1 = inlined_call_operand.vmem [shape: f32[160,128], index: 1, kind: input, shape index: {}]   ;;  %s2596_s2 = inlined_call_operand.vmem [shape: f32[160,1], index: 2, kind: input, shape index: {}]   ;;  %s2597_s3 = inlined_call_operand.hbm [shape: f32[2,128,256], index: 3, kind: output, shape index: {}]  }
   0x1   :  { %10 = vsyncpa [#allocation4 + $0x1], 0 }
   0x2   :  { %11 = vsyncpa [#allocation5], 0 }
   0x3   :  { %13 = vsyncpa [#allocation5 + $0x1], 0  ;;  %s1992_s12 = smov 0   ;;  %s1994_s13 = smov 0  }
   0x4   :  { %s1996_s14 = smov 0   ;;  %s1998_s15 = smov 0  }
   0x5   :  { %s2000_s16 = smov 0   ;;  %s2002_s17 = smov 0  }
   0x6   :  { %s2004_s18 = smov 0   ;;  %s2006_s19 = smov 0  }
   0x7   :  { %s2008_s20 = smov 0   ;;  %s2010_s21 = smov 0  }
   0x8   :  { %s2012_s22 = smov 0  }
   0x9 LB: > { %s1405_s23 = sadd.s32 4294967295, %s1958_s22   ;;  %s1406_s24 = sadd.s32 4294967294, %s1958_s22   ;;  %s1958_s22 = sphi %s2012_s22, %s19_s22   ;;  %s1954_s21 = sphi %s2010_s21, %s2621_s21   ;;  %s1950_s20 = sphi %s2008_s20, %s2620_s20   ;;  %s1946_s19 = sphi %s2006_s19, %s2619_s19   ;;  %s1942_s18 = sphi %s2004_s18, %s2618_s18   ;;  %s1938_s17 = sphi %s2002_s17, %s2617_s17   ;;  %s1934_s16 = sphi %s2000_s16, %s2616_s16   ;;  %s1930_s15 = sphi %s1998_s15, %s2615_s15   ;;  %s1926_s14 = sphi %s1996_s14, %s2614_s14   ;;  %s1922_s13 = sphi %s1994_s13, %s2613_s13   ;;  %s1918_s12 = sphi %s1992_s12, %s2612_s12  }
   0xa   : > { %s28_s25 = sadd.s32 1, %s1950_s20  ;;  %s31_s26 = sadd.s32 1, %s1954_s21 }
   0xb   : > { %p29_p0 = scmp.ge.s32.totalorder %s28_s25, 2  ;;  %s38_s27 = sadd.s32 1, %s1938_s17 }
   0xc   : > { %p45_p1 = scmp.ne.s32.totalorder %s1938_s17, %s1934_s16  ;;  %p46_p2 = scmp.eq.s32.totalorder %s1958_s22, 0 }
   0xd   : > { %s2623_s25 = smov (%p29_p0, %s28_s25), 0  ;;  %s2625_s26 = smov (!%p29_p0, %s31_s26), %s1954_s21 }
   0xe   : > { %p2056_p3 = por %p46_p2, %p45_p1  ;;  %p51_p4 = scmp.ne.s32.totalorder %s1934_s16, %s1930_s15 }
   0xf   : > { %p33_p5 = scmp.ge.s32.totalorder %s2625_s26, 2  ;;  %p52_p6 = scmp.eq.s32.totalorder %s1405_s23, 0 }
  0x10   : > { %s104_s29 = ssub.s32 %s1950_s20, %s2623_s25  ;;  %s108_s30 = sadd.s32 1, %s1926_s14 }
  0x11   : > { %s2627_s26 = smov (%p33_p5, %s2625_s26), 0  ;;  %p2066_p7 = por %p52_p6, %p51_p4 }
  0x12   : > { %2602 = sst [smem:[#allocation9_spill]] %s2627_s26  ;;  %p118_p8 = scmp.ne.s32.totalorder %s1926_s14, %s1922_s13 }
  0x13   : > { %s35_s5 = ssub.s32 %s1954_s21, %s2627_s26  ;;  %p119_p9 = scmp.eq.s32.totalorder %s1405_s23, 3 }
  0x14   : > { %p36_p10 = scmp.eq.s32.totalorder %s35_s5, 0  ;;  %s105_s6 = sor.u32 %s104_s29, %s35_s5 }
  0x15   : > { %p106_p11 = scmp.eq.s32.totalorder %s105_s6, 0  ;;  %p2074_p12 = por %p119_p9, %p118_p8 }
  0x16   : > { %s2079_s8 = scalar_select %p36_p10, %s1938_s17, %s38_s27  }
  0x17   : > { %s2604_s7 = scalar_select %p2074_p12, 1, 0 }
  0x18   : > { %s2082_s9 = scalar_select %p106_p11, %s1926_s14, %s108_s30  }
  0x19   : > { %p124_p13 = scmp.ne.s32.totalorder %s1922_s13, %s1918_s12  ;;  %p125_p0 = scmp.eq.s32.totalorder %s1406_s24, 3 }
  0x1a   : > { %p1637_p1 = scmp.lt.s32.totalorder %s1958_s22, 4  ;;  %s151_s11 = sand.u32 1, %s1938_s17  }
  0x1b   : > { %p2087_p2 = por %p125_p0, %p124_p13  ;;  %s1409_s15 = sshll.u32 %s151_s11, 8 }
  0x1c   : > { %s1439_s23 = sshll.u32 %s1954_s21, 12  ;;  %s155_s27 = scalar_lea.vmem [#allocation3], %s1409_s15 }
  0x1d   : > { %s2605_s10 = scalar_select %p2087_p2, 1, 0 }
  0x1e   : > { %s2096_s6 = scalar_lea.hbm %s2594_s0, %s1439_s23  ;;  %s162_s30 = sshll.u32 %s155_s27, 4  ;;  %s2098_s30 = int_to_ptr.vmem [resolvable:$true] %s162_s30 }
  0x1f   : > { %p2102_p4 = pnand %p1637_p1, %p2056_p3  ;;  %s2107_s26 = scalar_lea.sflag [#allocation4], %s151_s11 }
  0x20   : > { %s1806_s23 = scalar_lea.hbm %s2096_s6, 4096  ;;  %s1811_s28 = scalar_lea.hbm %s2594_s0, 8192 }
  0x21   : > { %p1807_p6 = scmp.ne.s32.totalorder %s2096_s6, %s1806_s23  ;;  %p1808_p8 = pneg %p2102_p4 }
  0x22   : > { %p1812_p3 = scmp.lt.u32.totalorder %s2096_s6, %s2594_s0  ;;  %p1813_p11 = scmp.lt.u32.totalorder %s1811_s28, %s1806_s23 }
  0x23   : > { %p1809_p9 = pnand %p1808_p8, %p1807_p6  ;;  %p1815_p0 = scmp.lt.u32.totalorder %s1806_s23, %s2096_s6 }
  0x24   : > { %p1814_p13 = por %p1813_p11, %p1812_p3 }
  0x25   : > { %p1810_p10 = pneg %p1809_p9 }
  0x26   : > { %p1816_p1 = por %p1815_p0, %p1814_p13 }
  0x28   : > { %p1817_p5 = pnand %p1816_p1, %p1810_p10 }
  0x2a   : > { %1820 = shalt.err (!%p1817_p5)
}
  0x2b   : > { %s1821_s11 = scalar_lea.vmem %s2098_s30, 4096  ;;  %s1960_s15 = smov [#allocation3]  }
  0x2c   : > { %p1822_p6 = scmp.ne.s32.totalorder %s2098_s30, %s1821_s11  ;;  %s1826_s29 = sshll.u32 %s1960_s15, 4  ;;  %s1827_s29 = int_to_ptr.vmem [resolvable:$false] %s1826_s29 }
  0x2d   : > { %s1828_s5 = scalar_lea.vmem %s1827_s29, 8192  ;;  %p1829_p12 = scmp.lt.s32.totalorder %s2098_s30, %s1827_s29 }
  0x2e   : > { %p1824_p9 = pnand %p1822_p6, %p1808_p8  ;;  %p1830_p3 = scmp.lt.s32.totalorder %s1828_s5, %s1821_s11 }
  0x30   : > { %p1825_p2 = pneg %p1824_p9  ;;  %p1831_p11 = por %p1830_p3, %p1829_p12 }
  0x32   : > { %p1832_p13 = pnand %p1831_p11, %p1825_p2 }
  0x34   : > { %1835 = shalt.err (!%p1832_p13)
}
  0x35   : > { %s1961_s23 = smov 256   ;;  %s1962_s28 = smov 16  }
  0x36   : > { %1632 = dma.hbm_to_vmem [thread:$0]  (!%p2102_p4), %s2096_s6, 4096, %s2098_s30, %s2107_s26, %s1961_s23, %s1961_s23, %s1962_s28  }
  0x37   : > { %p170_p5 = scmp.lt.s32.totalorder %s1958_s22, 5  ;;  %p2607_p8 = scmp.ge.s32.totalorder %s1958_s22, 1 }
  0x39   : > { %p171_p10 = pnand %p2607_p8, %p170_p5 }
  0x3a   : > { %s176_s27 = sand.u32 (!%p171_p10), 1, %s1934_s16  }
  0x3b   : > { %174 = sbr.rel (%p171_p10) target bundleno = 1471 (0x5bf), region = 32  ;;  %s1413_s11 = sshll.u32 (!%p171_p10), %s176_s27, 8 }
  0x3c   : > { %s177_s15 = scalar_lea.sflag (!%p171_p10), [#allocation4], %s176_s27  ;;  %s2139_s29 = scalar_lea.vmem (!%p171_p10), [#allocation3], %s1413_s11 }
  0x42   : > { %1909 = dma.done.wait (%p2066_p7), %s177_s15, 4096  }
  0x43   : > { %1911 = vsyncadd (%p2066_p7), %s177_s15, 4294963200  ;;  %s2600_s24 = sand.u32 1, %s1922_s13   ;;  %p1415_p12 = scmp.ne.s32.totalorder %s1942_s18, 0 }
  0x44   : > { %s1414_s26 = sshll.u32 %s2600_s24, 7  ;;  %v208_v0 = vld [vmem:[%s2139_s29 + $0x8] sm:$0xff] (!%p1415_p12)  ;;  %v210_v1 = vld [vmem:[%s2139_s29 + $0x18] sm:$0xff] (!%p1415_p12)  ;;  %v207_v2 = vld [vmem:[%s2139_s29] sm:$0xff] (!%p1415_p12)  ;;  %v1963_v7 = vmov (!%p1415_p12), 0.0   ;;  %v1964_v13 = vmov (!%p1415_p12), 0  }
  0x45   : > { %s2148_s6 = scalar_lea.vmem [#allocation6], %s1414_s26  ;;  %206 = sbr.rel (%p1415_p12) target bundleno = 351 (0x15f), region = 40  ;;  %v1493_v3 = vpack.c.bf16 (!%p1415_p12), %v210_v1, %v208_v0  ;;  %v209_v4 = vld [vmem:[%s2139_s29 + $0x10] sm:$0xff] (!%p1415_p12)  ;;  %v212_v5 = vld [vmem:[%s2139_s29 + $0x28] sm:$0xff] (!%p1415_p12)  ;;  %v214_v6 = vld [vmem:[%s2139_s29 + $0x38] sm:$0xff] (!%p1415_p12)  ;;  %429 = vmatprep.mubr.f32.mxu0 (!%p1415_p12), %v1963_v7  ;;  %483 = vmatprep.mubr.f32.mxu1 (!%p1415_p12), %v1963_v7 }
  0x46   : > { %v1495_v8 = vpack.c.bf16 (!%p1415_p12), %v209_v4, %v207_v2  ;;  %v1497_v9 = vpack.c.bf16 (!%p1415_p12), %v214_v6, %v212_v5  ;;  %v211_v10 = vld [vmem:[%s2139_s29 + $0x20] sm:$0xff] (!%p1415_p12)  ;;  %v213_v11 = vld [vmem:[%s2139_s29 + $0x30] sm:$0xff] (!%p1415_p12)  ;;  %v216_v12 = vld [vmem:[%s2139_s29 + $0x48] sm:$0xff] (!%p1415_p12)  ;;  %1738 = vset.pattern.permute.xlu1 (!%p1415_p12), %v1964_v13  ;;  %1737 = vset.pattern.permute.xlu0 (!%p1415_p12), %v1964_v13 }
  0x47   : > { %1494 = vmatprep.subr.bf16.mxu0 (!%p1415_p12), %v1493_v3  ;;  %1593 = vmatprep.subr.bf16.mxu1 (!%p1415_p12), %v1493_v3  ;;  %v218_v14 = vld [vmem:[%s2139_s29 + $0x58] sm:$0xff] (!%p1415_p12)  ;;  %v1499_v15 = vpack.c.bf16 (!%p1415_p12), %v213_v11, %v211_v10  ;;  %v215_v17 = vld [vmem:[%s2139_s29 + $0x40] sm:$0xff] (!%p1415_p12)  ;;  %v217_v18 = vld [vmem:[%s2139_s29 + $0x50] sm:$0xff] (!%p1415_p12) }
  0x48   : > { %1496 = vmatpush1.bf16.msra.mxu0 (!%p1415_p12), %v1495_v8  ;;  %1601 = vmatpush1.bf16.msra.mxu1 (!%p1415_p12), %v1495_v8  ;;  %v1501_v16 = vpack.c.bf16 (!%p1415_p12), %v218_v14, %v216_v12  ;;  %v220_v19 = vld [vmem:[%s2139_s29 + $0x68] sm:$0xff] (!%p1415_p12)  ;;  %v222_v20 = vld [vmem:[%s2139_s29 + $0x78] sm:$0xff] (!%p1415_p12)  ;;  %v1503_v21 = vpack.c.bf16 (!%p1415_p12), %v217_v18, %v215_v17  ;;  %v219_v23 = vld [vmem:[%s2139_s29 + $0x60] sm:$0xff] (!%p1415_p12) }
  0x49   : > { %1498 = vmatprep.subr.bf16.mxu0 (!%p1415_p12), %v1497_v9  ;;  %1594 = vmatprep.subr.bf16.mxu1 (!%p1415_p12), %v1497_v9  ;;  %v1505_v22 = vpack.c.bf16 (!%p1415_p12), %v222_v20, %v220_v19  ;;  %v221_v24 = vld [vmem:[%s2139_s29 + $0x70] sm:$0xff] (!%p1415_p12)  ;;  %v224_v25 = vld [vmem:[%s2139_s29 + $0x88] sm:$0xff] (!%p1415_p12)  ;;  %v226_v26 = vld [vmem:[%s2139_s29 + $0x98] sm:$0xff] (!%p1415_p12) }
  0x4a   : > { %v1507_v27 = vpack.c.bf16 (!%p1415_p12), %v221_v24, %v219_v23  ;;  %v1509_v28 = vpack.c.bf16 (!%p1415_p12), %v226_v26, %v224_v25  ;;  %v223_v29 = vld [vmem:[%s2139_s29 + $0x80] sm:$0xff] (!%p1415_p12)  ;;  %v225_v30 = vld [vmem:[%s2139_s29 + $0x90] sm:$0xff] (!%p1415_p12)  ;;  %v228_v31 = vld [vmem:[%s2139_s29 + $0xa8] sm:$0xff] (!%p1415_p12)  ;;  %v574_v23 = vlaneseq (!%p1415_p12)  ;;  %v1965_v24 = vmov (!%p1415_p12), 1.0  }
  0x4b   : > { %v230_v32 = vld [vmem:[%s2139_s29 + $0xb8] sm:$0xff] (!%p1415_p12)  ;;  %v1511_v33 = vpack.c.bf16 (!%p1415_p12), %v225_v30, %v223_v29  ;;  %v259_v34 = vld [vmem:[%s2596_s2 + $0x20] sm:$0xff] (!%p1415_p12)  ;;  %v227_v36 = vld [vmem:[%s2139_s29 + $0xa0] sm:$0xff] (!%p1415_p12) }
  0x4c   : > { %1500 = vmatpush1.bf16.msra.mxu0 %v1499_v15  ;;  %1602 = vmatpush1.bf16.msra.mxu1 %v1499_v15  ;;  %v1513_v35 = vpack.c.bf16 %v230_v32, %v228_v31  ;;  %v229_v37 = vld [vmem:[%s2139_s29 + $0xb0] sm:$0xff]  ;;  %v257_v38 = vld [vmem:[%s2596_s2 + $0x10] sm:$0xff]  ;;  %v232_v39 = vld [vmem:[%s2139_s29 + $0xc8] sm:$0xff]  ;;  %vm576_vm0 = vcmp.lt.s32.totalorder %v574_v23, 256 }
  0x4d   : > { %1502 = vmatprep.subr.bf16.mxu0 %v1501_v16  ;;  %1595 = vmatprep.subr.bf16.mxu1 %v1501_v16  ;;  %v234_v40 = vld [vmem:[%s2139_s29 + $0xd8] sm:$0xff]  ;;  %v258_v42 = vld [vmem:[%s2596_s2 + $0x18] sm:$0xff]  ;;  %v1515_v43 = vpack.c.bf16 %v229_v37, %v227_v36  ;;  %v231_v45 = vld [vmem:[%s2139_s29 + $0xc0] sm:$0xff]  ;;  %579 = vst.msk [vmem:[#allocation2 + $0x120] ss:$8 sm:$0x3] %vm576_vm0, %v1965_v24 }
  0x4e   : > { %287 = vperm.xlu1 %1738, %v259_v34   ;;  %277 = vperm.xlu0 %1737, %v257_v38   ;;  %v260_v41 = vld [vmem:[%s2596_s2 + $0x28] sm:$0xff]  ;;  %v1517_v44 = vpack.c.bf16 %v234_v40, %v232_v39  ;;  %v233_v46 = vld [vmem:[%s2139_s29 + $0xd0] sm:$0xff]  ;;  %v236_v47 = vld [vmem:[%s2139_s29 + $0xe8] sm:$0xff] }
  0x4f   : > { %v238_v48 = vld [vmem:[%s2139_s29 + $0xf8] sm:$0xff]  ;;  %v262_v49 = vld [vmem:[%s2596_s2 + $0x38] sm:$0xff]  ;;  %v261_v50 = vld [vmem:[%s2596_s2 + $0x30] sm:$0xff]  ;;  %v1519_v51 = vpack.c.bf16 %v233_v46, %v231_v45 }
  0x50   : > { %1504 = vmatpush1.bf16.msra.mxu0 %v1503_v21  ;;  %1603 = vmatpush1.bf16.msra.mxu1 %v1503_v21  ;;  %v1521_v52 = vpack.c.bf16 %v238_v48, %v236_v47  ;;  %v235_v53 = vld [vmem:[%s2139_s29 + $0xe0] sm:$0xff]  ;;  %v237_v54 = vld [vmem:[%s2139_s29 + $0xf0] sm:$0xff]  ;;  %v264_v55 = vld [vmem:[%s2596_s2 + $0x48] sm:$0xff] }
  0x51   : > { %1506 = vmatprep.subr.bf16.mxu0 %v1505_v22  ;;  %1596 = vmatprep.subr.bf16.mxu1 %v1505_v22  ;;  %v263_v56 = vld [vmem:[%s2596_s2 + $0x40] sm:$0xff]  ;;  %v1523_v57 = vpack.c.bf16 %v237_v54, %v235_v53  ;;  %v266_v58 = vld [vmem:[%s2596_s2 + $0x58] sm:$0xff]  ;;  %v265_v59 = vld [vmem:[%s2596_s2 + $0x50] sm:$0xff] }
  0x52   : > { %292 = vperm.xlu1 %1738, %v260_v41   ;;  %282 = vperm.xlu0 %1737, %v258_v42   ;;  %v239_v60 = vld [vmem:[%s2595_s1 + $0x10] sm:$0xff]  ;;  %v248_v61 = vld [vmem:[%s2595_s1 + $0x58] sm:$0xff]  ;;  %v268_v62 = vld [vmem:[%s2596_s2 + $0x68] sm:$0xff] }
  0x53   : > { %v267_v63 = vld [vmem:[%s2596_s2 + $0x60] sm:$0xff]  ;;  %v240_v0 = vld [vmem:[%s2595_s1 + $0x18] sm:$0xff]  ;;  %v269_v3 = vld [vmem:[%s2596_s2 + $0x70] sm:$0xff] }
  0x54   : > { %1508 = vmatpush1.bf16.msra.mxu0 %v1507_v27  ;;  %1604 = vmatpush1.bf16.msra.mxu1 %v1507_v27  ;;  %v249_v1 = vld [vmem:[%s2595_s1 + $0x60] sm:$0xff]  ;;  %v270_v2 = vld [vmem:[%s2596_s2 + $0x78] sm:$0xff]  ;;  %v250_v5 = vld [vmem:[%s2595_s1 + $0x68] sm:$0xff] }
  0x55   : > { %1510 = vmatprep.subr.bf16.mxu0 %v1509_v28  ;;  %1597 = vmatprep.subr.bf16.mxu1 %v1509_v28  ;;  %v241_v4 = vld [vmem:[%s2595_s1 + $0x20] sm:$0xff]  ;;  %v272_v6 = vld [vmem:[%s2596_s2 + $0x88] sm:$0xff]  ;;  %v251_v10 = vld [vmem:[%s2595_s1 + $0x70] sm:$0xff] }
  0x56   : > { %302 = vperm.xlu1 %1738, %v262_v49   ;;  %297 = vperm.xlu0 %1737, %v261_v50   ;;  %v271_v8 = vld [vmem:[%s2596_s2 + $0x80] sm:$0xff]  ;;  %v242_v9 = vld [vmem:[%s2595_s1 + $0x28] sm:$0xff]  ;;  %v274_v11 = vld [vmem:[%s2596_s2 + $0x98] sm:$0xff] }
  0x57   : > { %v273_v12 = vld [vmem:[%s2596_s2 + $0x90] sm:$0xff]  ;;  %v252_v14 = vld [vmem:[%s2595_s1 + $0x78] sm:$0xff]  ;;  %v253_v16 = vld [vmem:[%s2595_s1 + $0x80] sm:$0xff] }
  0x58   : > { %1512 = vmatpush1.bf16.msra.mxu0 %v1511_v33  ;;  %1605 = vmatpush1.bf16.msra.mxu1 %v1511_v33  ;;  %v243_v13 = vld [vmem:[%s2595_s1 + $0x30] sm:$0xff]  ;;  %v244_v15 = vld [vmem:[%s2595_s1 + $0x38] sm:$0xff]  ;;  %v245_v17 = vld [vmem:[%s2595_s1 + $0x40] sm:$0xff] }
  0x59   : > { %1514 = vmatprep.subr.bf16.mxu0 %v1513_v35  ;;  %1598 = vmatprep.subr.bf16.mxu1 %v1513_v35  ;;  %v254_v18 = vld [vmem:[%s2595_s1 + $0x88] sm:$0xff]  ;;  %v255_v20 = vld [vmem:[%s2595_s1 + $0x90] sm:$0xff]  ;;  %v256_v22 = vld [vmem:[%s2595_s1 + $0x98] sm:$0xff] }
  0x5a   : > { %312 = vperm.xlu1 %1738, %v264_v55   ;;  %307 = vperm.xlu0 %1737, %v263_v56   ;;  %v246_v19 = vld [vmem:[%s2595_s1 + $0x48] sm:$0xff]  ;;  %v247_v21 = vld [vmem:[%s2595_s1 + $0x50] sm:$0xff] }
  0x5c   : > { %1516 = vmatpush1.bf16.msra.mxu0 %v1515_v43  ;;  %1606 = vmatpush1.bf16.msra.mxu1 %v1515_v43 }
  0x5d   : > { %1518 = vmatprep.subr.bf16.mxu0 %v1517_v44  ;;  %1599 = vmatprep.subr.bf16.mxu1 %v1517_v44 }
  0x5e   : > { %322 = vperm.xlu1 %1738, %v266_v58   ;;  %317 = vperm.xlu0 %1737, %v265_v59  }
  0x60   : > { %1520 = vmatpush1.bf16.msra.mxu0 %v1519_v51  ;;  %1607 = vmatpush1.bf16.msra.mxu1 %v1519_v51 }
  0x61   : > { %1522 = vmatprep.subr.bf16.mxu0 %v1521_v52  ;;  %1600 = vmatprep.subr.bf16.mxu1 %v1521_v52 }
  0x62   : > { %332 = vperm.xlu1 %1738, %v268_v62   ;;  %327 = vperm.xlu0 %1737, %v267_v63  }
  0x64   : > { %1524 = vmatpush1.bf16.msra.mxu0 %v1523_v57  ;;  %1608 = vmatpush1.bf16.msra.mxu1 %v1523_v57 }
  0x66   : > { %342 = vperm.xlu1 %1738, %v270_v2   ;;  %337 = vperm.xlu0 %1737, %v269_v3  }
  0x67   : > { %430 = vmatmul.mubr.f32.vlgmr.msra.gmra.mrb[0].mxu0 %v239_v60  ;;  %484 = vmatmul.mubr.f32.vlgmr.msra.gmra.mrb[0].mxu1 %v248_v61 }
  0x68   : > { %435 = vmatprep.mubr.f32.mxu0 %v1963_v7  ;;  %489 = vmatprep.mubr.f32.mxu1 %v1963_v7 }
  0x6a   : > { %352 = vperm.xlu1 %1738, %v272_v6   ;;  %347 = vperm.xlu0 %1737, %v271_v8  }
  0x6b   : > { %436 = vmatmul.mubr.f32.gmra.mrb[2].mxu0 %v240_v0  ;;  %490 = vmatmul.mubr.f32.gmra.mrb[2].mxu1 %v249_v1 }
  0x6c   : > { %441 = vmatprep.mubr.f32.mxu0 %v1963_v7  ;;  %495 = vmatprep.mubr.f32.mxu1 %v1963_v7 }
  0x6e   : > { %362 = vperm.xlu1 %1738, %v274_v11   ;;  %357 = vperm.xlu0 %1737, %v273_v12  }
  0x6f   : > { %442 = vmatmul.mubr.f32.gmra.mrb[4].mxu0 %v241_v4  ;;  %496 = vmatmul.mubr.f32.gmra.mrb[4].mxu1 %v250_v5 }
  0x70   : > { %447 = vmatprep.mubr.f32.mxu0 %v1963_v7  ;;  %501 = vmatprep.mubr.f32.mxu1 %v1963_v7 }
  0x73   : > { %448 = vmatmul.mubr.f32.gmra.mrb[6].mxu0 %v242_v9  ;;  %502 = vmatmul.mubr.f32.gmra.mrb[6].mxu1 %v251_v10 }
  0x74   : > { %453 = vmatprep.mubr.f32.mxu0 %v1963_v7  ;;  %507 = vmatprep.mubr.f32.mxu1 %v1963_v7 }
  0x77   : > { %454 = vmatmul.mubr.f32.gmra.mrb[8].mxu0 %v243_v13  ;;  %508 = vmatmul.mubr.f32.gmra.mrb[8].mxu1 %v252_v14 }
  0x78   : > { %459 = vmatprep.mubr.f32.mxu0 %v1963_v7  ;;  %513 = vmatprep.mubr.f32.mxu1 %v1963_v7 }
  0x7b   : > { %460 = vmatmul.mubr.f32.gmra.mrb[10].mxu0 %v244_v15  ;;  %514 = vmatmul.mubr.f32.gmra.mrb[10].mxu1 %v253_v16 }
  0x7c   : > { %465 = vmatprep.mubr.f32.mxu0 %v1963_v7  ;;  %519 = vmatprep.mubr.f32.mxu1 %v1963_v7 }
  0x7f   : > { %466 = vmatmul.mubr.f32.gmra.mrb[12].mxu0 %v245_v17  ;;  %520 = vmatmul.mubr.f32.gmra.mrb[12].mxu1 %v254_v18 }
  0x80   : > { %471 = vmatprep.mubr.f32.mxu0 %v1963_v7  ;;  %525 = vmatprep.mubr.f32.mxu1 %v1963_v7 }
  0x83   : > { %472 = vmatmul.mubr.f32.gmra.mrb[14].mxu0 %v246_v19  ;;  %526 = vmatmul.mubr.f32.gmra.mrb[14].mxu1 %v255_v20 }
  0x84   : > { %477 = vmatprep.mubr.f32.mxu0 %v1963_v7  ;;  %531 = vmatprep.mubr.f32.mxu1 %v1963_v7 }
  0x87   : > { %478 = vmatmul.mubr.f32.gmra.mrb[16].mxu0 %v247_v21  ;;  %532 = vmatmul.mubr.f32.gmra.mrb[16].mxu1 %v256_v22 }
  0xcd   : > { %v278_v25 = vpop.permute.xlu0 %277  ;;  %v288_v26 = vpop.permute.xlu1 %287 }
  0xd1   : > { %v283_v27 = vpop.permute.xlu0 %282  ;;  %v293_v28 = vpop.permute.xlu1 %292 }
  0xd5   : > { %v2309_v29 = vpop.permute.xlu0 %297  ;;  %v2311_v7 = vpop.permute.xlu1 %302 }
  0xd9   : > { %v2313_v30 = vpop.permute.xlu0 %307  ;;  %v2315_v31 = vpop.permute.xlu1 %312 }
  0xdd   : > { %v2317_v32 = vpop.permute.xlu0 %317  ;;  %v323_v33 = vpop.permute.xlu1 %322 }
  0xe1   : > { %v328_v42 = vpop.permute.xlu0 %327  ;;  %v333_v51 = vpop.permute.xlu1 %332 }
  0xe5   : > { %v338_v60 = vpop.permute.xlu0 %337  ;;  %v343_v5 = vpop.permute.xlu1 %342 }
  0xe9   : > { %v348_v15 = vpop.permute.xlu0 %347  ;;  %v353_v24 = vpop.permute.xlu1 %352 }
 0x13a   : > { %v431_v34 = vpop.f32.mrb[0].mxu0  ;;  %v485_v35 = vpop.f32.mrb[0].mxu1 }
 0x13b   : > { %v432_v36 = vadd.f32 %v431_v34, %v278_v25  ;;  %v486_v37 = vadd.f32 %v485_v35, %v323_v33  ;;  %v433_v38 = vpop.f32.mrb[1].mxu0  ;;  %v487_v39 = vpop.f32.mrb[1].mxu1 }
 0x13c   : > { %v434_v40 = vadd.f32 %v433_v38, %v278_v25  ;;  %v488_v41 = vadd.f32 %v487_v39, %v323_v33 }
 0x13d   : > { %538 = vst [vmem:[#allocation2] sm:$0xff] %v432_v36  ;;  %556 = vst [vmem:[#allocation2 + $0x90] sm:$0xff] %v486_v37  ;;  %v358_v36 = vpop.permute.xlu0 %357 }
 0x13e   : > { %539 = vst [vmem:[#allocation2 + $0x8] sm:$0xff] %v434_v40  ;;  %557 = vst [vmem:[#allocation2 + $0x98] sm:$0xff] %v488_v41  ;;  %v437_v43 = vpop.f32.mrb[2].mxu0  ;;  %v491_v44 = vpop.f32.mrb[2].mxu1 }
 0x13f   : > { %v438_v45 = vadd.f32 %v437_v43, %v283_v27  ;;  %v492_v46 = vadd.f32 %v491_v44, %v328_v42  ;;  %v439_v47 = vpop.f32.mrb[3].mxu0  ;;  %v493_v48 = vpop.f32.mrb[3].mxu1 }
 0x140   : > { %v440_v49 = vadd.f32 %v439_v47, %v283_v27  ;;  %v494_v50 = vadd.f32 %v493_v48, %v328_v42  ;;  %v363_v44 = vpop.permute.xlu1 %362 }
 0x141   : > { %540 = vst [vmem:[#allocation2 + $0x10] sm:$0xff] %v438_v45  ;;  %558 = vst [vmem:[#allocation2 + $0xa0] sm:$0xff] %v492_v46 }
 0x142   : > { %541 = vst [vmem:[#allocation2 + $0x18] sm:$0xff] %v440_v49  ;;  %559 = vst [vmem:[#allocation2 + $0xa8] sm:$0xff] %v494_v50  ;;  %v443_v52 = vpop.f32.mrb[4].mxu0  ;;  %v497_v53 = vpop.f32.mrb[4].mxu1 }
 0x143   : > { %v444_v54 = vadd.f32 %v443_v52, %v288_v26  ;;  %v498_v55 = vadd.f32 %v497_v53, %v333_v51  ;;  %v445_v56 = vpop.f32.mrb[5].mxu0  ;;  %v499_v57 = vpop.f32.mrb[5].mxu1 }
 0x144   : > { %v446_v58 = vadd.f32 %v445_v56, %v288_v26  ;;  %v500_v59 = vadd.f32 %v499_v57, %v333_v51 }
 0x145   : > { %542 = vst [vmem:[#allocation2 + $0x20] sm:$0xff] %v444_v54  ;;  %560 = vst [vmem:[#allocation2 + $0xb0] sm:$0xff] %v498_v55 }
 0x146   : > { %543 = vst [vmem:[#allocation2 + $0x28] sm:$0xff] %v446_v58  ;;  %561 = vst [vmem:[#allocation2 + $0xb8] sm:$0xff] %v500_v59  ;;  %v449_v61 = vpop.f32.mrb[6].mxu0  ;;  %v503_v62 = vpop.f32.mrb[6].mxu1 }
 0x147   : > { %v450_v63 = vadd.f32 %v449_v61, %v293_v28  ;;  %v504_v0 = vadd.f32 %v503_v62, %v338_v60  ;;  %v451_v1 = vpop.f32.mrb[7].mxu0  ;;  %v505_v2 = vpop.f32.mrb[7].mxu1 }
 0x148   : > { %v452_v3 = vadd.f32 %v451_v1, %v293_v28  ;;  %v506_v4 = vadd.f32 %v505_v2, %v338_v60 }
 0x149   : > { %544 = vst [vmem:[#allocation2 + $0x30] sm:$0xff] %v450_v63  ;;  %562 = vst [vmem:[#allocation2 + $0xc0] sm:$0xff] %v504_v0 }
 0x14a   : > { %545 = vst [vmem:[#allocation2 + $0x38] sm:$0xff] %v452_v3  ;;  %563 = vst [vmem:[#allocation2 + $0xc8] sm:$0xff] %v506_v4  ;;  %v455_v6 = vpop.f32.mrb[8].mxu0  ;;  %v509_v8 = vpop.f32.mrb[8].mxu1 }
 0x14b   : > { %v456_v9 = vadd.f32 %v455_v6, %v2309_v29  ;;  %v510_v10 = vadd.f32 %v509_v8, %v343_v5  ;;  %v457_v11 = vpop.f32.mrb[9].mxu0  ;;  %v511_v12 = vpop.f32.mrb[9].mxu1 }
 0x14c   : > { %v458_v13 = vadd.f32 %v457_v11, %v2309_v29  ;;  %v512_v14 = vadd.f32 %v511_v12, %v343_v5 }
 0x14d   : > { %546 = vst [vmem:[#allocation2 + $0x40] sm:$0xff] %v456_v9  ;;  %564 = vst [vmem:[#allocation2 + $0xd0] sm:$0xff] %v510_v10 }
 0x14e   : > { %547 = vst [vmem:[#allocation2 + $0x48] sm:$0xff] %v458_v13  ;;  %565 = vst [vmem:[#allocation2 + $0xd8] sm:$0xff] %v512_v14  ;;  %v461_v16 = vpop.f32.mrb[10].mxu0  ;;  %v515_v17 = vpop.f32.mrb[10].mxu1 }
 0x14f   : > { %v462_v18 = vadd.f32 %v461_v16, %v2311_v7  ;;  %v516_v19 = vadd.f32 %v515_v17, %v348_v15  ;;  %v463_v20 = vpop.f32.mrb[11].mxu0  ;;  %v517_v21 = vpop.f32.mrb[11].mxu1 }
 0x150   : > { %v464_v22 = vadd.f32 %v463_v20, %v2311_v7  ;;  %v518_v23 = vadd.f32 %v517_v21, %v348_v15 }
 0x151   : > { %548 = vst [vmem:[#allocation2 + $0x50] sm:$0xff] %v462_v18  ;;  %566 = vst [vmem:[#allocation2 + $0xe0] sm:$0xff] %v516_v19 }
 0x152   : > { %549 = vst [vmem:[#allocation2 + $0x58] sm:$0xff] %v464_v22  ;;  %567 = vst [vmem:[#allocation2 + $0xe8] sm:$0xff] %v518_v23  ;;  %v467_v25 = vpop.f32.mrb[12].mxu0  ;;  %v521_v26 = vpop.f32.mrb[12].mxu1 }
 0x153   : > { %v468_v27 = vadd.f32 %v467_v25, %v2313_v30  ;;  %v522_v28 = vadd.f32 %v521_v26, %v353_v24  ;;  %v469_v29 = vpop.f32.mrb[13].mxu0  ;;  %v523_v33 = vpop.f32.mrb[13].mxu1 }
 0x154   : > { %v470_v34 = vadd.f32 %v469_v29, %v2313_v30  ;;  %v524_v35 = vadd.f32 %v523_v33, %v353_v24 }
 0x155   : > { %550 = vst [vmem:[#allocation2 + $0x60] sm:$0xff] %v468_v27  ;;  %568 = vst [vmem:[#allocation2 + $0xf0] sm:$0xff] %v522_v28 }
 0x156   : > { %551 = vst [vmem:[#allocation2 + $0x68] sm:$0xff] %v470_v34  ;;  %569 = vst [vmem:[#allocation2 + $0xf8] sm:$0xff] %v524_v35  ;;  %v473_v7 = vpop.f32.mrb[14].mxu0  ;;  %v527_v37 = vpop.f32.mrb[14].mxu1 }
 0x157   : > { %v474_v38 = vadd.f32 %v473_v7, %v2315_v31  ;;  %v528_v39 = vadd.f32 %v527_v37, %v358_v36  ;;  %v475_v40 = vpop.f32.mrb[15].mxu0  ;;  %v529_v41 = vpop.f32.mrb[15].mxu1 }
 0x158   : > { %v476_v42 = vadd.f32 %v475_v40, %v2315_v31  ;;  %v530_v43 = vadd.f32 %v529_v41, %v358_v36 }
 0x159   : > { %552 = vst [vmem:[#allocation2 + $0x70] sm:$0xff] %v474_v38  ;;  %570 = vst [vmem:[#allocation2 + $0x100] sm:$0xff] %v528_v39 }
 0x15a   : > { %553 = vst [vmem:[#allocation2 + $0x78] sm:$0xff] %v476_v42  ;;  %571 = vst [vmem:[#allocation2 + $0x108] sm:$0xff] %v530_v43  ;;  %v479_v30 = vpop.f32.mrb[16].mxu0  ;;  %v533_v45 = vpop.f32.mrb[16].mxu1 }
 0x15b   : > { %v480_v46 = vadd.f32 %v479_v30, %v2317_v32  ;;  %v534_v47 = vadd.f32 %v533_v45, %v363_v44  ;;  %v481_v48 = vpop.f32.mrb[17].mxu0  ;;  %v535_v49 = vpop.f32.mrb[17].mxu1 }
 0x15c   : > { %v482_v50 = vadd.f32 %v481_v48, %v2317_v32  ;;  %v536_v51 = vadd.f32 %v535_v49, %v363_v44 }
 0x15d   : > { %554 = vst [vmem:[#allocation2 + $0x80] sm:$0xff] %v480_v46  ;;  %572 = vst [vmem:[#allocation2 + $0x110] sm:$0xff] %v534_v47 }
 0x15e   : > { %555 = vst [vmem:[#allocation2 + $0x88] sm:$0xff] %v482_v50  ;;  %573 = vst [vmem:[#allocation2 + $0x118] sm:$0xff] %v536_v51 }
 0x15f PF: > { %s1416_s4 = sshll.u32 %s1942_s18, 7  ;;  %v602_v31 = vld [vmem:[%s2595_s1] sm:$0xff]  ;;  %v1966_v32 = vmov 0   ;;  %v605_v53 = vld [vmem:[%s2596_s2 + $0x8] sm:$0xff]  ;;  %v726_v17 = vld [vmem:[#allocation2 + $0x18] sm:$0xff]  ;;  %v1967_v21 = vmov 0.0  }
 0x160   : > { %v604_v52 = vld [vmem:[%s2596_s2] sm:$0xff]  ;;  %s582_s27 = sshra.s32 %s1416_s4, 7  ;;  %1490 = vmatprep.mubr.f32.mxu0 %v602_v31  ;;  %1739 = vset.pattern.permute.xlu0 %v1966_v32  ;;  %v603_v15 = vld [vmem:[%s2595_s1 + $0x8] sm:$0xff]  ;;  %v725_v20 = vld [vmem:[#allocation2 + $0x10] sm:$0xff]  ;;  %vm727_vm1 = vcmask 130048   ;;  %s1435_s4 = sshll.u32 %s1946_s19, 5 }
 0x161   : > { %s1417_s11 = sshll.u32 %s582_s27, 3  ;;  %608 = vperm.xlu0 %1739, %v604_v52   ;;  %v724_v16 = vld [vmem:[#allocation2 + $0x8] sm:$0xff]  ;;  %v723_v18 = vld [vmem:[#allocation2] sm:$0xff]  ;;  %840 = vmatprep.mubr.f32.mxu1 %v1967_v21  ;;  %s1314_s30 = sadd.s32 %s1942_s18, %s1435_s4 }
 0x162   : > { %s2337_s15 = scalar_lea.vmem %s2139_s29, %s1417_s11 [#allocation3]  ;;  %v1557_v19 = vpack.c.bf16 %v726_v17, %v724_v16  ;;  %v1559_v22 = vpack.c.bf16 %v725_v20, %v723_v18  ;;  %s1436_s5 = sshll.u32 %s1314_s30, 7 }
 0x163   : > { %v586_v54 = vld [vmem:[%s2337_s15] sm:$0xff]  ;;  %v587_v55 = vld [vmem:[%s2337_s15 + $0x10] sm:$0xff]  ;;  %s1317_s23 = sshll.u32 %s2148_s6, 4  ;;  %s2511_s18 = scalar_lea.hbm %s2597_s3, %s1436_s5  ;;  %s2517_s23 = int_to_ptr.vmem [resolvable:$true] %s1317_s23 }
 0x164   : > { %v588_v56 = vld [vmem:[%s2337_s15 + $0x20] sm:$0xff]  ;;  %v1525_v57 = vpack.c.bf16 %v587_v55, %v586_v54  ;;  %v589_v58 = vld [vmem:[%s2337_s15 + $0x30] sm:$0xff]  ;;  %1558 = vmatprep.subr.bf16.mxu1 %v1557_v19  ;;  %s2608_s27 = sand.u32 1, %s1922_s13   ;;  %p2609_p2 = scmp.ne.s32.totalorder %s2604_s7, 0 }
 0x165   : > { %v1529_v59 = vpack.c.bf16 %v589_v58, %v588_v56  ;;  %v590_v60 = vld [vmem:[%s2337_s15 + $0x40] sm:$0xff]  ;;  %v591_v61 = vld [vmem:[%s2337_s15 + $0x50] sm:$0xff]  ;;  %613 = vperm.xlu0 %1739, %v605_v53   ;;  %1560 = vmatpush1.bf16.msra.mxu1 %v1559_v22  ;;  %s2533_s11 = scalar_lea.sflag [#allocation5], %s2608_s27  ;;  %s1968_s26 = smov [#allocation6]  }
 0x166   : > { %1526 = vmatprep.subr.bf16.mxu0 %v1525_v57  ;;  %v1533_v62 = vpack.c.bf16 %v591_v61, %v590_v60  ;;  %v592_v63 = vld [vmem:[%s2337_s15 + $0x60] sm:$0xff]  ;;  %v593_v0 = vld [vmem:[%s2337_s15 + $0x70] sm:$0xff]  ;;  %s1840_s29 = sshll.u32 %s1968_s26, 4  ;;  %s1841_s29 = int_to_ptr.vmem [resolvable:$false] %s1840_s29 }
 0x167   : > { %1528 = vmatpush3.bf16.msra.mxu0 %v1525_v57  ;;  %v1537_v1 = vpack.c.bf16 %v593_v0, %v592_v63  ;;  %v594_v2 = vld [vmem:[%s2337_s15 + $0x80] sm:$0xff]  ;;  %v595_v3 = vld [vmem:[%s2337_s15 + $0x90] sm:$0xff]  ;;  %s1842_s24 = scalar_lea.vmem %s1841_s29, 4096  ;;  %p1843_p1 = scmp.lt.s32.totalorder %s2517_s23, %s1841_s29 }
 0x168   : > { %1530 = vmatprep.subr.bf16.mxu0 %v1529_v59  ;;  %v1541_v4 = vpack.c.bf16 %v595_v3, %v594_v2  ;;  %v596_v5 = vld [vmem:[%s2337_s15 + $0xa0] sm:$0xff]  ;;  %v597_v6 = vld [vmem:[%s2337_s15 + $0xb0] sm:$0xff] }
 0x169   : > { %v1545_v8 = vpack.c.bf16 %v597_v6, %v596_v5  ;;  %v598_v9 = vld [vmem:[%s2337_s15 + $0xc0] sm:$0xff]  ;;  %v599_v10 = vld [vmem:[%s2337_s15 + $0xd0] sm:$0xff] }
 0x16a   : > { %v1549_v11 = vpack.c.bf16 %v599_v10, %v598_v9  ;;  %v600_v12 = vld [vmem:[%s2337_s15 + $0xe0] sm:$0xff]  ;;  %v601_v13 = vld [vmem:[%s2337_s15 + $0xf0] sm:$0xff]  ;;  %s1836_s15 = scalar_lea.vmem %s2517_s23, 2048 }
 0x16b   : > { %1532 = vmatpush3.bf16.msra.mxu0 %v1529_v59  ;;  %v1553_v14 = vpack.c.bf16 %v601_v13, %v600_v12  ;;  %p1837_p7 = scmp.ne.s32.totalorder %s2517_s23, %s1836_s15  ;;  %p1844_p6 = scmp.lt.s32.totalorder %s1842_s24, %s1836_s15 }
 0x16c   : > { %1534 = vmatprep.subr.bf16.mxu0 %v1533_v62 }
 0x16d   : > { %p1838_p4 = pnand %p1837_p7, %p2609_p2  ;;  %p1845_p9 = por %p1844_p6, %p1843_p1 }
 0x16f   : > { %1536 = vmatpush3.bf16.msra.mxu0 %v1533_v62  ;;  %p1839_p0 = pneg %p1838_p4 }
 0x170   : > { %1538 = vmatprep.subr.bf16.mxu0 %v1537_v1 }
 0x171   : > { %p1846_p3 = pnand %p1845_p9, %p1839_p0 }
 0x173   : > { %1540 = vmatpush3.bf16.msra.mxu0 %v1537_v1 }
 0x174   : > { %1542 = vmatprep.subr.bf16.mxu0 %v1541_v4 }
 0x177   : > { %1544 = vmatpush3.bf16.msra.mxu0 %v1541_v4 }
 0x178   : > { %1546 = vmatprep.subr.bf16.mxu0 %v1545_v8 }
 0x17b   : > { %1548 = vmatpush3.bf16.msra.mxu0 %v1545_v8 }
 0x17c   : > { %1550 = vmatprep.subr.bf16.mxu0 %v1549_v11 }
 0x17f   : > { %1552 = vmatpush3.bf16.msra.mxu0 %v1549_v11 }
 0x180   : > { %1554 = vmatprep.subr.bf16.mxu0 %v1553_v14 }
 0x183   : > { %1556 = vmatpush3.bf16.msra.mxu0 %v1553_v14 }
 0x186   : > { %1491 = vmatmul.mubr.f32.vlgmr.msra.gmra.mrb[0].mxu0 %v603_v15 }
 0x1e0   : > { %v609_v23 = vpop.permute.xlu0 %608 }
 0x1e4   : > { %v614_v27 = vpop.permute.xlu0 %613 }
 0x259   : > { %v1492_v24 = vpop.f32.mrb[0].mxu0 }
 0x25a   : > { %v682_v25 = vpop.f32.mrb[1].mxu0  ;;  %v688_v28 = vadd.f32 %v1492_v24, %v614_v27 }
 0x25b   : > { %v683_v26 = vadd.f32 %v682_v25, %v609_v23 }
 0x25d   : > { %691 = vxpose.xlu1.b32.start [1/2] (short) %v683_v26, 128 }
 0x261   : > { %692 = vxpose.xlu1.b32.end [2/2] (short) %v688_v28, 128 }
 0x2dd   : > { %v707_v29 = vpop.trf.xlu1 }
 0x2de   : > { %1418 = vmatmul.mubr.msk.f32.vlgmr.msra.gmra.mrb[0].mxu1 %vm727_vm1, %v707_v29  ;;  %v1092_v29 = vld [vmem:[#allocation2 + $0x78] sm:$0xff] }
 0x2df   : > { %846 = vmatprep.mubr.f32.mxu1 %v1967_v21 }
 0x2e1   : > { %v708_v33 = vpop.trf.xlu1 }
 0x2e2   : > { %1419 = vmatmul.mubr.msk.f32.gmra.mrb[2].mxu1 %vm727_vm1, %v708_v33  ;;  %v1082_v33 = vld [vmem:[#allocation2 + $0x28] sm:$0xff] }
 0x2e3   : > { %852 = vmatprep.mubr.f32.mxu1 %v1967_v21  ;;  %1179 = vmatprep.mubr.f32.mxu0 %v1082_v33 }
 0x2e5   : > { %v709_v34 = vpop.trf.xlu1 }
 0x2e6   : > { %1420 = vmatmul.mubr.msk.f32.gmra.mrb[4].mxu1 %vm727_vm1, %v709_v34 }
 0x2e7   : > { %858 = vmatprep.mubr.f32.mxu1 %v1967_v21 }
 0x2e9   : > { %v710_v35 = vpop.trf.xlu1 }
 0x2ea   : > { %1421 = vmatmul.mubr.msk.f32.gmra.mrb[6].mxu1 %vm727_vm1, %v710_v35 }
 0x2eb   : > { %864 = vmatprep.mubr.f32.mxu1 %v1967_v21 }
 0x2ed   : > { %v711_v36 = vpop.trf.xlu1 }
 0x2ee   : > { %1422 = vmatmul.mubr.msk.f32.gmra.mrb[8].mxu1 %vm727_vm1, %v711_v36 }
 0x2ef   : > { %870 = vmatprep.mubr.f32.mxu1 %v1967_v21 }
 0x2f1   : > { %v712_v7 = vpop.trf.xlu1 }
 0x2f2   : > { %1423 = vmatmul.mubr.msk.f32.gmra.mrb[10].mxu1 %vm727_vm1, %v712_v7 }
 0x2f3   : > { %876 = vmatprep.mubr.f32.mxu1 %v1967_v21 }
 0x2f5   : > { %v713_v37 = vpop.trf.xlu1 }
 0x2f6   : > { %1424 = vmatmul.mubr.msk.f32.gmra.mrb[12].mxu1 %vm727_vm1, %v713_v37 }
 0x2f7   : > { %882 = vmatprep.mubr.f32.mxu1 %v1967_v21 }
 0x2f9   : > { %v714_v38 = vpop.trf.xlu1 }
 0x2fa   : > { %1425 = vmatmul.mubr.msk.f32.gmra.mrb[14].mxu1 %vm727_vm1, %v714_v38 }
 0x2fb   : > { %888 = vmatprep.mubr.f32.mxu1 %v1967_v21 }
 0x2fd   : > { %v715_v39 = vpop.trf.xlu1 }
 0x2fe   : > { %1426 = vmatmul.mubr.msk.f32.gmra.mrb[16].mxu1 %vm727_vm1, %v715_v39 }
 0x2ff   : > { %894 = vmatprep.mubr.f32.mxu1 %v1967_v21 }
 0x301   : > { %v716_v40 = vpop.trf.xlu1 }
 0x302   : > { %1427 = vmatmul.mubr.msk.f32.gmra.mrb[18].mxu1 %vm727_vm1, %v716_v40 }
 0x303   : > { %900 = vmatprep.mubr.f32.mxu1 %v1967_v21 }
 0x305   : > { %v717_v41 = vpop.trf.xlu1 }
 0x306   : > { %1428 = vmatmul.mubr.msk.f32.gmra.mrb[20].mxu1 %vm727_vm1, %v717_v41 }
 0x307   : > { %906 = vmatprep.mubr.f32.mxu1 %v1967_v21 }
 0x309   : > { %v718_v42 = vpop.trf.xlu1 }
 0x30a   : > { %1429 = vmatmul.mubr.msk.f32.gmra.mrb[22].mxu1 %vm727_vm1, %v718_v42 }
 0x30b   : > { %912 = vmatprep.mubr.f32.mxu1 %v1967_v21 }
 0x30d   : > { %v719_v43 = vpop.trf.xlu1 }
 0x30e   : > { %1430 = vmatmul.mubr.msk.f32.gmra.mrb[24].mxu1 %vm727_vm1, %v719_v43 }
 0x30f   : > { %918 = vmatprep.mubr.f32.mxu1 %v1967_v21 }
 0x311   : > { %v720_v44 = vpop.trf.xlu1 }
 0x312   : > { %1431 = vmatmul.mubr.msk.f32.gmra.mrb[26].mxu1 %vm727_vm1, %v720_v44 }
 0x313   : > { %924 = vmatprep.mubr.f32.mxu1 %v1967_v21 }
 0x315   : > { %v721_v30 = vpop.trf.xlu1 }
 0x316   : > { %1432 = vmatmul.mubr.msk.f32.gmra.mrb[28].mxu1 %vm727_vm1, %v721_v30 }
 0x317   : > { %930 = vmatprep.mubr.f32.mxu1 %v1967_v21 }
 0x319   : > { %v722_v45 = vpop.trf.xlu1 }
 0x31a   : > { %1433 = vmatmul.mubr.msk.f32.gmra.mrb[30].mxu1 %vm727_vm1, %v722_v45 }
 0x31b   : > { %1204 = vmatprep.mubr.f32.mxu1 %v1092_v29 }
 0x3b1   : > { %v2377_v46 = vpop.f32.mrb[0].mxu1 }
 0x3b2   : > { %v2379_v47 = vpop.f32.mrb[1].mxu1 }
 0x3b3   : > { %v937_v48 = vmax.f32 %v2377_v46, %v2379_v47 }
 0x3b5   : > { %938 = vmax.xlane.f32.xlu0 %v937_v48  ;;  %v2383_v49 = vpop.f32.mrb[2].mxu1 }
 0x3b6   : > { %v2385_v50 = vpop.f32.mrb[3].mxu1 }
 0x3b7   : > { %v940_v51 = vmax.f32 %v2383_v49, %v2385_v50 }
 0x3b9   : > { %941 = vmax.xlane.f32.xlu1 %v940_v51  ;;  %v2389_v31 = vpop.f32.mrb[4].mxu1 }
 0x3ba   : > { %v2391_v52 = vpop.f32.mrb[5].mxu1 }
 0x3bb   : > { %v943_v32 = vmax.f32 %v2389_v31, %v2391_v52 }
 0x3bd   : > { %944 = vmax.xlane.f32.xlu0 %v943_v32  ;;  %v2395_v53 = vpop.f32.mrb[6].mxu1 }
 0x3be   : > { %v2397_v54 = vpop.f32.mrb[7].mxu1 }
 0x3bf   : > { %v946_v55 = vmax.f32 %v2395_v53, %v2397_v54 }
 0x3c1   : > { %947 = vmax.xlane.f32.xlu0 %v946_v55  ;;  %v2401_v56 = vpop.f32.mrb[8].mxu1 }
 0x3c2   : > { %v2403_v57 = vpop.f32.mrb[9].mxu1 }
 0x3c3   : > { %v949_v58 = vmax.f32 %v2401_v56, %v2403_v57 }
 0x3c5   : > { %950 = vmax.xlane.f32.xlu0 %v949_v58  ;;  %v2407_v59 = vpop.f32.mrb[10].mxu1 }
 0x3c6   : > { %v2409_v60 = vpop.f32.mrb[11].mxu1 }
 0x3c7   : > { %v952_v61 = vmax.f32 %v2407_v59, %v2409_v60 }
 0x3c9   : > { %953 = vmax.xlane.f32.xlu0 %v952_v61  ;;  %v2413_v62 = vpop.f32.mrb[12].mxu1 }
 0x3ca   : > { %v2415_v63 = vpop.f32.mrb[13].mxu1 }
 0x3cb   : > { %v955_v0 = vmax.f32 %v2413_v62, %v2415_v63 }
 0x3cd   : > { %956 = vmax.xlane.f32.xlu0 %v955_v0  ;;  %v2419_v1 = vpop.f32.mrb[14].mxu1 }
 0x3ce   : > { %v2421_v2 = vpop.f32.mrb[15].mxu1 }
 0x3cf   : > { %v958_v3 = vmax.f32 %v2419_v1, %v2421_v2 }
 0x3d1   : > { %959 = vmax.xlane.f32.xlu0 %v958_v3  ;;  %v2425_v4 = vpop.f32.mrb[16].mxu1 }
 0x3d2   : > { %v2427_v5 = vpop.f32.mrb[17].mxu1 }
 0x3d3   : > { %v961_v6 = vmax.f32 %v2425_v4, %v2427_v5 }
 0x3d5   : > { %962 = vmax.xlane.f32.xlu0 %v961_v6  ;;  %v2431_v8 = vpop.f32.mrb[18].mxu1 }
 0x3d6   : > { %v2433_v9 = vpop.f32.mrb[19].mxu1 }
 0x3d7   : > { %v964_v10 = vmax.f32 %v2431_v8, %v2433_v9 }
 0x3d9   : > { %965 = vmax.xlane.f32.xlu0 %v964_v10  ;;  %v2437_v11 = vpop.f32.mrb[20].mxu1 }
 0x3da   : > { %v2439_v12 = vpop.f32.mrb[21].mxu1 }
 0x3db   : > { %v967_v13 = vmax.f32 %v2437_v11, %v2439_v12 }
 0x3dd   : > { %968 = vmax.xlane.f32.xlu0 %v967_v13  ;;  %v2443_v14 = vpop.f32.mrb[22].mxu1 }
 0x3de   : > { %v2445_v15 = vpop.f32.mrb[23].mxu1 }
 0x3df   : > { %v970_v16 = vmax.f32 %v2443_v14, %v2445_v15 }
 0x3e1   : > { %971 = vmax.xlane.f32.xlu0 %v970_v16  ;;  %v2449_v17 = vpop.f32.mrb[24].mxu1 }
 0x3e2   : > { %v2451_v18 = vpop.f32.mrb[25].mxu1 }
 0x3e3   : > { %v973_v19 = vmax.f32 %v2449_v17, %v2451_v18 }
 0x3e5   : > { %974 = vmax.xlane.f32.xlu0 %v973_v19  ;;  %v2455_v20 = vpop.f32.mrb[26].mxu1 }
 0x3e6   : > { %v2457_v21 = vpop.f32.mrb[27].mxu1 }
 0x3e7   : > { %v976_v22 = vmax.f32 %v2455_v20, %v2457_v21 }
 0x3e9   : > { %977 = vmax.xlane.f32.xlu0 %v976_v22  ;;  %v2461_v23 = vpop.f32.mrb[28].mxu1 }
 0x3ea   : > { %v2463_v24 = vpop.f32.mrb[29].mxu1 }
 0x3eb   : > { %v979_v25 = vmax.f32 %v2461_v23, %v2463_v24 }
 0x3ed   : > { %980 = vmax.xlane.f32.xlu0 %v979_v25  ;;  %v2467_v26 = vpop.f32.mrb[30].mxu1 }
 0x3ee   : > { %v2469_v27 = vpop.f32.mrb[31].mxu1 }
 0x3ef   : > { %v982_v28 = vmax.f32 %v2467_v26, %v2469_v27 }
 0x3f1   : > { %983 = vmax.xlane.f32.xlu0 %v982_v28 }
 0x442   : > { %v939_v34 = vpop.xlane.xlu0 %938 }
 0x443   : > { %v985_v35 = vsub.f32 %v2377_v46, %v939_v34  ;;  %v986_v36 = vsub.f32 %v2379_v47, %v939_v34 }
 0x445   : > { %v1017_v7 = vmul.f32 1.442695, %v985_v35  ;;  %v1019_v37 = vmul.f32 1.442695, %v986_v36 }
 0x446   : > { %v942_v38 = vpop.xlane.xlu1 %941 }
 0x447   : > { %v987_v39 = vsub.f32 %v2383_v49, %v942_v38  ;;  %v988_v40 = vsub.f32 %v2385_v50, %v942_v38  ;;  %1740 = vpow2.f32 %v1017_v7 }
 0x448   : > { %1742 = vpow2.f32 %v1019_v37 }
 0x449   : > { %v1021_v41 = vmul.f32 1.442695, %v987_v39  ;;  %v1023_v42 = vmul.f32 1.442695, %v988_v40 }
 0x44a   : > { %v945_v43 = vpop.xlane.xlu0 %944 }
 0x44b   : > { %1744 = vpow2.f32 %v1021_v41  ;;  %v989_v44 = vsub.f32 %v2389_v31, %v945_v43  ;;  %v990_v30 = vsub.f32 %v2391_v52, %v945_v43 }
 0x44c   : > { %1746 = vpow2.f32 %v1023_v42 }
 0x44d   : > { %v1025_v45 = vmul.f32 1.442695, %v989_v44  ;;  %v1027_v46 = vmul.f32 1.442695, %v990_v30 }
 0x44e   : > { %v948_v47 = vpop.xlane.xlu0 %947 }
 0x44f   : > { %v991_v48 = vsub.f32 %v2395_v53, %v948_v47  ;;  %v992_v49 = vsub.f32 %v2397_v54, %v948_v47  ;;  %1748 = vpow2.f32 %v1025_v45 }
 0x450   : > { %1750 = vpow2.f32 %v1027_v46 }
 0x451   : > { %v1029_v50 = vmul.f32 1.442695, %v991_v48  ;;  %v1031_v51 = vmul.f32 1.442695, %v992_v49  ;;  %v1741_v55 = vpop.eup %1740 }
 0x452   : > { %v951_v32 = vpop.xlane.xlu0 %950  ;;  %v1743_v52 = vpop.eup %1742 }
 0x453   : > { %1752 = vpow2.f32 %v1029_v50  ;;  %v993_v58 = vsub.f32 %v2401_v56, %v951_v32  ;;  %v994_v31 = vsub.f32 %v2403_v57, %v951_v32 }
 0x454   : > { %1754 = vpow2.f32 %v1031_v51 }
 0x455   : > { %v1745_v61 = vpop.eup %1744  ;;  %v1033_v0 = vmul.f32 1.442695, %v993_v58  ;;  %v1035_v6 = vmul.f32 1.442695, %v994_v31 }
 0x456   : > { %v1747_v3 = vpop.eup %1746  ;;  %v954_v53 = vpop.xlane.xlu0 %953  ;;  %v1563_v10 = vpack.c.bf16 %v1745_v61, %v1741_v55 }
 0x457   : > { %v995_v54 = vsub.f32 %v2407_v59, %v954_v53  ;;  %v996_v13 = vsub.f32 %v2409_v60, %v954_v53  ;;  %v1561_v16 = vpack.c.bf16 %v1747_v3, %v1743_v52  ;;  %1756 = vpow2.f32 %v1033_v0 }
 0x458   : > { %1758 = vpow2.f32 %v1035_v6 }
 0x459   : > { %v1037_v19 = vmul.f32 1.442695, %v995_v54  ;;  %v1039_v22 = vmul.f32 1.442695, %v996_v13  ;;  %1562 = vmatprep.subr.bf16.mxu0 %v1561_v16  ;;  %1609 = vmatprep.subr.bf16.mxu1 %v1561_v16  ;;  %v1749_v57 = vpop.eup %1748 }
 0x45a   : > { %1564 = vmatpush1.bf16.xpose.msra.mxu0 %v1563_v10  ;;  %1617 = vmatpush1.bf16.xpose.msra.mxu1 %v1563_v10  ;;  %v957_v56 = vpop.xlane.xlu0 %956  ;;  %v1751_v29 = vpop.eup %1750 }
 0x45b   : > { %1760 = vpow2.f32 %v1037_v19  ;;  %v997_v25 = vsub.f32 %v2413_v62, %v957_v56  ;;  %v998_v28 = vsub.f32 %v2415_v63, %v957_v56 }
 0x45c   : > { %1762 = vpow2.f32 %v1039_v22 }
 0x45d   : > { %v1753_v59 = vpop.eup %1752  ;;  %v1041_v60 = vmul.f32 1.442695, %v997_v25  ;;  %v1043_v34 = vmul.f32 1.442695, %v998_v28 }
 0x45e   : > { %v1755_v33 = vpop.eup %1754  ;;  %v960_v35 = vpop.xlane.xlu0 %959  ;;  %v1567_v36 = vpack.c.bf16 %v1753_v59, %v1749_v57 }
 0x45f   : > { %v999_v7 = vsub.f32 %v2419_v1, %v960_v35  ;;  %v1000_v37 = vsub.f32 %v2421_v2, %v960_v35  ;;  %v1565_v38 = vpack.c.bf16 %v1755_v33, %v1751_v29  ;;  %1764 = vpow2.f32 %v1041_v60 }
 0x460   : > { %1766 = vpow2.f32 %v1043_v34 }
 0x461   : > { %v1045_v39 = vmul.f32 1.442695, %v999_v7  ;;  %v1047_v40 = vmul.f32 1.442695, %v1000_v37  ;;  %1566 = vmatprep.subr.bf16.mxu0 %v1565_v38  ;;  %1610 = vmatprep.subr.bf16.mxu1 %v1565_v38  ;;  %v1757_v63 = vpop.eup %1756 }
 0x462   : > { %1568 = vmatpush1.bf16.xpose.msra.mxu0 %v1567_v36  ;;  %1618 = vmatpush1.bf16.xpose.msra.mxu1 %v1567_v36  ;;  %v963_v62 = vpop.xlane.xlu0 %962  ;;  %v1759_v43 = vpop.eup %1758 }
 0x463   : > { %1768 = vpow2.f32 %v1045_v39  ;;  %v1001_v41 = vsub.f32 %v2425_v4, %v963_v62  ;;  %v1002_v42 = vsub.f32 %v2427_v5, %v963_v62 }
 0x464   : > { %1770 = vpow2.f32 %v1047_v40 }
 0x465   : > { %v1761_v1 = vpop.eup %1760  ;;  %v1049_v2 = vmul.f32 1.442695, %v1001_v41  ;;  %v1051_v30 = vmul.f32 1.442695, %v1002_v42 }
 0x466   : > { %v1763_v44 = vpop.eup %1762  ;;  %v966_v45 = vpop.xlane.xlu0 %965  ;;  %v1571_v46 = vpack.c.bf16 %v1761_v1, %v1757_v63 }
 0x467   : > { %v1003_v47 = vsub.f32 %v2431_v8, %v966_v45  ;;  %v1004_v48 = vsub.f32 %v2433_v9, %v966_v45  ;;  %v1569_v49 = vpack.c.bf16 %v1763_v44, %v1759_v43  ;;  %1772 = vpow2.f32 %v1049_v2 }
 0x468   : > { %1774 = vpow2.f32 %v1051_v30 }
 0x469   : > { %v1053_v50 = vmul.f32 1.442695, %v1003_v47  ;;  %v1055_v51 = vmul.f32 1.442695, %v1004_v48  ;;  %1570 = vmatprep.subr.bf16.mxu0 %v1569_v49  ;;  %1611 = vmatprep.subr.bf16.mxu1 %v1569_v49  ;;  %v1765_v5 = vpop.eup %1764  ;;  %v1091_v48 = vld [vmem:[#allocation2 + $0x70] sm:$0xff]  ;;  %v1081_v49 = vld [vmem:[#allocation2 + $0x20] sm:$0xff] }
 0x46a   : > { %1572 = vmatpush1.bf16.xpose.msra.mxu0 %v1571_v46  ;;  %1619 = vmatpush1.bf16.xpose.msra.mxu1 %v1571_v46  ;;  %v969_v4 = vpop.xlane.xlu0 %968  ;;  %v1767_v58 = vpop.eup %1766 }
 0x46b   : > { %1776 = vpow2.f32 %v1053_v50  ;;  %v1005_v32 = vsub.f32 %v2437_v11, %v969_v4  ;;  %v1006_v55 = vsub.f32 %v2439_v12, %v969_v4  ;;  %v1094_v50 = vld [vmem:[#allocation2 + $0x88] sm:$0xff]  ;;  %v1093_v4 = vld [vmem:[#allocation2 + $0x80] sm:$0xff] }
 0x46c   : > { %1778 = vpow2.f32 %v1055_v51  ;;  %v1084_v51 = vld [vmem:[#allocation2 + $0x38] sm:$0xff] }
 0x46d   : > { %v1769_v8 = vpop.eup %1768  ;;  %v1057_v9 = vmul.f32 1.442695, %v1005_v32  ;;  %v1059_v52 = vmul.f32 1.442695, %v1006_v55  ;;  %v1096_v32 = vld [vmem:[#allocation2 + $0x98] sm:$0xff]  ;;  %v1086_v55 = vld [vmem:[#allocation2 + $0x48] sm:$0xff] }
 0x46e   : > { %v1771_v31 = vpop.eup %1770  ;;  %v972_v61 = vpop.xlane.xlu0 %971  ;;  %v1575_v0 = vpack.c.bf16 %v1769_v8, %v1765_v5  ;;  %v1083_v5 = vld [vmem:[#allocation2 + $0x30] sm:$0xff]  ;;  %v1085_v8 = vld [vmem:[#allocation2 + $0x40] sm:$0xff] }
 0x46f   : > { %v1007_v3 = vsub.f32 %v2443_v14, %v972_v61  ;;  %v1008_v6 = vsub.f32 %v2445_v15, %v972_v61  ;;  %v1573_v53 = vpack.c.bf16 %v1771_v31, %v1767_v58  ;;  %1780 = vpow2.f32 %v1057_v9  ;;  %v1095_v58 = vld [vmem:[#allocation2 + $0x90] sm:$0xff]  ;;  %v1098_v9 = vld [vmem:[#allocation2 + $0xa8] sm:$0xff]  ;;  %v1088_v31 = vld [vmem:[#allocation2 + $0x58] sm:$0xff] }
 0x470   : > { %1782 = vpow2.f32 %v1059_v52  ;;  %v1097_v52 = vld [vmem:[#allocation2 + $0xa0] sm:$0xff]  ;;  %v1087_v61 = vld [vmem:[#allocation2 + $0x50] sm:$0xff] }
 0x471   : > { %v1061_v10 = vmul.f32 1.442695, %v1007_v3  ;;  %v1063_v54 = vmul.f32 1.442695, %v1008_v6  ;;  %1574 = vmatprep.subr.bf16.mxu0 %v1573_v53  ;;  %1612 = vmatprep.subr.bf16.mxu1 %v1573_v53  ;;  %v1773_v12 = vpop.eup %1772  ;;  %v1090_v3 = vld [vmem:[#allocation2 + $0x68] sm:$0xff]  ;;  %v1099_v6 = vld [vmem:[#allocation2 + $0xb0] sm:$0xff] }
 0x472   : > { %1576 = vmatpush1.bf16.xpose.msra.mxu0 %v1575_v0  ;;  %1620 = vmatpush1.bf16.xpose.msra.mxu1 %v1575_v0  ;;  %v975_v11 = vpop.xlane.xlu0 %974  ;;  %v1775_v19 = vpop.eup %1774  ;;  %v1100_v0 = vld [vmem:[#allocation2 + $0xb8] sm:$0xff]  ;;  %v1089_v53 = vld [vmem:[#allocation2 + $0x60] sm:$0xff] }
 0x473   : > { %1784 = vpow2.f32 %v1061_v10  ;;  %v1009_v13 = vsub.f32 %v2449_v17, %v975_v11  ;;  %v1010_v16 = vsub.f32 %v2451_v18, %v975_v11  ;;  %v1102_v10 = vld [vmem:[#allocation2 + $0xc8] sm:$0xff]  ;;  %v1104_v11 = vld [vmem:[#allocation2 + $0xd8] sm:$0xff] }
 0x474   : > { %1786 = vpow2.f32 %v1063_v54  ;;  %v1101_v54 = vld [vmem:[#allocation2 + $0xc0] sm:$0xff] }
 0x475   : > { %v1777_v14 = vpop.eup %1776  ;;  %v1065_v15 = vmul.f32 1.442695, %v1009_v13  ;;  %v1067_v56 = vmul.f32 1.442695, %v1010_v16  ;;  %v1106_v13 = vld [vmem:[#allocation2 + $0xe8] sm:$0xff]  ;;  %v1105_v16 = vld [vmem:[#allocation2 + $0xe0] sm:$0xff] }
 0x476   : > { %v1779_v22 = vpop.eup %1778  ;;  %v978_v57 = vpop.xlane.xlu0 %977  ;;  %v1579_v25 = vpack.c.bf16 %v1777_v14, %v1773_v12  ;;  %v1103_v12 = vld [vmem:[#allocation2 + $0xd0] sm:$0xff] }
 0x477   : > { %v1011_v28 = vsub.f32 %v2455_v20, %v978_v57  ;;  %v1012_v29 = vsub.f32 %v2457_v21, %v978_v57  ;;  %v1577_v59 = vpack.c.bf16 %v1779_v22, %v1775_v19  ;;  %1788 = vpow2.f32 %v1065_v15  ;;  %v1108_v19 = vld [vmem:[#allocation2 + $0xf8] sm:$0xff]  ;;  %v1107_v14 = vld [vmem:[#allocation2 + $0xf0] sm:$0xff]  ;;  %v1110_v15 = vld [vmem:[#allocation2 + $0x108] sm:$0xff] }
 0x478   : > { %1790 = vpow2.f32 %v1067_v56  ;;  %v1109_v22 = vld [vmem:[#allocation2 + $0x100] sm:$0xff]  ;;  %v1112_v56 = vld [vmem:[#allocation2 + $0x118] sm:$0xff]  ;;  %v1111_v57 = vld [vmem:[#allocation2 + $0x110] sm:$0xff] }
 0x479   : > { %v1069_v60 = vmul.f32 1.442695, %v1011_v28  ;;  %v1071_v33 = vmul.f32 1.442695, %v1012_v29  ;;  %1578 = vmatprep.subr.bf16.mxu0 %v1577_v59  ;;  %1613 = vmatprep.subr.bf16.mxu1 %v1577_v59  ;;  %v1781_v18 = vpop.eup %1780  ;;  %v1113_v28 = vld [vmem:[#allocation2 + $0x120] sm:$0x1] }
 0x47a   : > { %1580 = vmatpush1.bf16.xpose.msra.mxu0 %v1579_v25  ;;  %1621 = vmatpush1.bf16.xpose.msra.mxu1 %v1579_v25  ;;  %v981_v17 = vpop.xlane.xlu0 %980  ;;  %v1783_v36 = vpop.eup %1782  ;;  %v1114_v25 = vld [vmem:[#allocation2 + $0x128] sm:$0x1] }
 0x47b   : > { %1792 = vpow2.f32 %v1069_v60  ;;  %v1013_v34 = vsub.f32 %v2461_v23, %v981_v17  ;;  %v1014_v35 = vsub.f32 %v2463_v24, %v981_v17 }
 0x47c   : > { %1794 = vpow2.f32 %v1071_v33 }
 0x47d   : > { %v1785_v20 = vpop.eup %1784  ;;  %v1073_v21 = vmul.f32 1.442695, %v1013_v34  ;;  %v1075_v37 = vmul.f32 1.442695, %v1014_v35 }
 0x47e   : > { %v1787_v7 = vpop.eup %1786  ;;  %v984_v38 = vpop.xlane.xlu0 %983  ;;  %v1583_v39 = vpack.c.bf16 %v1785_v20, %v1781_v18 }
 0x47f   : > { %v1015_v40 = vsub.f32 %v2467_v26, %v984_v38  ;;  %v1016_v62 = vsub.f32 %v2469_v27, %v984_v38  ;;  %v1581_v63 = vpack.c.bf16 %v1787_v7, %v1783_v36  ;;  %1796 = vpow2.f32 %v1073_v21 }
 0x480   : > { %1798 = vpow2.f32 %v1075_v37 }
 0x481   : > { %v1077_v41 = vmul.f32 1.442695, %v1015_v40  ;;  %v1079_v42 = vmul.f32 1.442695, %v1016_v62  ;;  %1582 = vmatprep.subr.bf16.mxu0 %v1581_v63  ;;  %1614 = vmatprep.subr.bf16.mxu1 %v1581_v63  ;;  %v1789_v23 = vpop.eup %1788 }
 0x482   : > { %1584 = vmatpush1.bf16.xpose.msra.mxu0 %v1583_v39  ;;  %1622 = vmatpush1.bf16.xpose.msra.mxu1 %v1583_v39  ;;  %v1791_v24 = vpop.eup %1790 }
 0x483   : > { %1800 = vpow2.f32 %v1077_v41 }
 0x484   : > { %1802 = vpow2.f32 %v1079_v42 }
 0x485   : > { %v1793_v43 = vpop.eup %1792 }
 0x486   : > { %v1795_v1 = vpop.eup %1794  ;;  %v1587_v2 = vpack.c.bf16 %v1793_v43, %v1789_v23 }
 0x487   : > { %v1585_v44 = vpack.c.bf16 %v1795_v1, %v1791_v24 }
 0x489   : > { %1586 = vmatprep.subr.bf16.mxu0 %v1585_v44  ;;  %1615 = vmatprep.subr.bf16.mxu1 %v1585_v44  ;;  %v1797_v26 = vpop.eup %1796 }
 0x48a   : > { %1588 = vmatpush1.bf16.xpose.msra.mxu0 %v1587_v2  ;;  %1623 = vmatpush1.bf16.xpose.msra.mxu1 %v1587_v2  ;;  %v1799_v27 = vpop.eup %1798 }
 0x48d   : > { %v1801_v30 = vpop.eup %1800 }
 0x48e   : > { %v1803_v45 = vpop.eup %1802  ;;  %v1591_v46 = vpack.c.bf16 %v1801_v30, %v1797_v26 }
 0x48f   : > { %v1589_v47 = vpack.c.bf16 %v1803_v45, %v1799_v27 }
 0x491   : > { %1590 = vmatprep.subr.bf16.mxu0 %v1589_v47  ;;  %1616 = vmatprep.subr.bf16.mxu1 %v1589_v47 }
 0x492   : > { %1592 = vmatpush1.bf16.xpose.msra.mxu0 %v1591_v46  ;;  %1624 = vmatpush1.bf16.xpose.msra.mxu1 %v1591_v46 }
 0x499   : > { %1205 = vmatmul.mubr.f32.vlgmr.msra.gmra.mrb[32].mxu1 %v1091_v48  ;;  %1180 = vmatmul.mubr.f32.vlgmr.msra.gmra.mrb[2].mxu0 %v1081_v49  ;;  %v1266_v49 = vlaneseq }
 0x49a   : > { %1209 = vmatprep.mubr.f32.mxu1 %v1094_v50  ;;  %1184 = vmatprep.mubr.f32.mxu0 %v1084_v51 }
 0x49b   : > { %v1267_v51 = vshrl.u32 %v1266_v49, 7 }
 0x49d   : > { %1210 = vmatmul.mubr.f32.gmra.mrb[34].mxu1 %v1093_v4  ;;  %1185 = vmatmul.mubr.f32.gmra.mrb[4].mxu0 %v1083_v5  ;;  %v1268_v4 = vsub.s32 0, %v1267_v51 }
 0x49e   : > { %1214 = vmatprep.mubr.f32.mxu1 %v1096_v32  ;;  %1189 = vmatprep.mubr.f32.mxu0 %v1086_v55 }
 0x4a1   : > { %1215 = vmatmul.mubr.f32.gmra.mrb[36].mxu1 %v1095_v58  ;;  %1190 = vmatmul.mubr.f32.gmra.mrb[6].mxu0 %v1085_v8 }
 0x4a2   : > { %1219 = vmatprep.mubr.f32.mxu1 %v1098_v9  ;;  %1194 = vmatprep.mubr.f32.mxu0 %v1088_v31 }
 0x4a5   : > { %1220 = vmatmul.mubr.f32.gmra.mrb[38].mxu1 %v1097_v52  ;;  %1195 = vmatmul.mubr.f32.gmra.mrb[8].mxu0 %v1087_v61 }
 0x4a6   : > { %1224 = vmatprep.mubr.f32.mxu1 %v1100_v0  ;;  %1199 = vmatprep.mubr.f32.mxu0 %v1090_v3 }
 0x4a9   : > { %1225 = vmatmul.mubr.f32.gmra.mrb[40].mxu1 %v1099_v6  ;;  %1200 = vmatmul.mubr.f32.gmra.mrb[10].mxu0 %v1089_v53 }
 0x4aa   : > { %1229 = vmatprep.mubr.f32.mxu1 %v1102_v10 }
 0x4ad   : > { %1230 = vmatmul.mubr.f32.gmra.mrb[42].mxu1 %v1101_v54 }
 0x4ae   : > { %1234 = vmatprep.mubr.f32.mxu1 %v1104_v11 }
 0x4b1   : > { %1235 = vmatmul.mubr.f32.gmra.mrb[44].mxu1 %v1103_v12 }
 0x4b2   : > { %1239 = vmatprep.mubr.f32.mxu1 %v1106_v13 }
 0x4b5   : > { %1240 = vmatmul.mubr.f32.gmra.mrb[46].mxu1 %v1105_v16 }
 0x4b6   : > { %1244 = vmatprep.mubr.f32.mxu1 %v1108_v19 }
 0x4b9   : > { %1245 = vmatmul.mubr.f32.gmra.mrb[48].mxu1 %v1107_v14 }
 0x4ba   : > { %1249 = vmatprep.mubr.f32.mxu1 %v1110_v15 }
 0x4bd   : > { %1250 = vmatmul.mubr.f32.gmra.mrb[50].mxu1 %v1109_v22 }
 0x4be   : > { %1254 = vmatprep.mubr.f32.mxu1 %v1112_v56 }
 0x4c1   : > { %1255 = vmatmul.mubr.f32.gmra.mrb[52].mxu1 %v1111_v57 }
 0x4c2   : > { %1259 = vmatprep.mubr.f32.mxu1 %v1114_v25 }
 0x4c5   : > { %1260 = vmatmul.mubr.f32.gmra.mrb[54].mxu1 %v1113_v28 }
 0x56c   : > { %v1206_v29 = vpop.f32.mrb[32].mxu1  ;;  %v1181_v59 = vpop.f32.mrb[2].mxu0 }
 0x56d   : > { %v1208_v60 = vpop.f32.mrb[33].mxu1  ;;  %v1183_v33 = vpop.f32.mrb[3].mxu0 }
 0x570   : > { %v1211_v17 = vpop.f32.mrb[34].mxu1  ;;  %v1186_v18 = vpop.f32.mrb[4].mxu0 }
 0x571   : > { %v1213_v34 = vpop.f32.mrb[35].mxu1  ;;  %v1188_v35 = vpop.f32.mrb[5].mxu0 }
 0x574   : > { %v1216_v36 = vpop.f32.mrb[36].mxu1  ;;  %v1191_v20 = vpop.f32.mrb[6].mxu0 }
 0x575   : > { %v1218_v21 = vpop.f32.mrb[37].mxu1  ;;  %v1193_v7 = vpop.f32.mrb[7].mxu0 }
 0x578   : > { %v1221_v37 = vpop.f32.mrb[38].mxu1  ;;  %v1196_v38 = vpop.f32.mrb[8].mxu0 }
 0x579   : > { %v1223_v39 = vpop.f32.mrb[39].mxu1  ;;  %v1198_v40 = vpop.f32.mrb[9].mxu0 }
 0x57c   : > { %v1226_v62 = vpop.f32.mrb[40].mxu1  ;;  %v1201_v63 = vpop.f32.mrb[10].mxu0 }
 0x57d   : > { %v1228_v41 = vpop.f32.mrb[41].mxu1  ;;  %v1203_v42 = vpop.f32.mrb[11].mxu0 }
 0x580   : > { %v1231_v23 = vpop.f32.mrb[42].mxu1 }
 0x581   : > { %v1233_v24 = vpop.f32.mrb[43].mxu1 }
 0x584   : > { %v1236_v43 = vpop.f32.mrb[44].mxu1 }
 0x585   : > { %v1238_v1 = vpop.f32.mrb[45].mxu1 }
 0x588   : > { %v1241_v2 = vpop.f32.mrb[46].mxu1 }
 0x589   : > { %v1243_v44 = vpop.f32.mrb[47].mxu1 }
 0x58c   : > { %v1246_v26 = vpop.f32.mrb[48].mxu1 }
 0x58d   : > { %v1248_v27 = vpop.f32.mrb[49].mxu1 }
 0x590   : > { %v1251_v30 = vpop.f32.mrb[50].mxu1 }
 0x591   : > { %v1253_v45 = vpop.f32.mrb[51].mxu1 }
 0x594   : > { %v1256_v46 = vpop.f32.mrb[52].mxu1 }
 0x595   : > { %v1258_v47 = vpop.f32.mrb[53].mxu1 }
 0x598   : > { %v1261_v48 = vpop.f32.mrb[54].mxu1 }
 0x599   : > { %1804 = vrcp.f32 %v1261_v48  ;;  %v1263_v50 = vpop.f32.mrb[55].mxu1 }
 0x5a3   : > { %v1805_v5 = vpop.eup %1804 }
 0x5a4   : > { %v1269_v32 = vrot.slane %v1805_v5, %v1268_v4 }
 0x5a6   : > { %v1271_v55 = vmul.f32 %v1269_v32, %v1186_v18  ;;  %v1272_v58 = vmul.f32 %v1269_v32, %v1191_v20  ;;  %v1273_v8 = vmul.f32 %v1269_v32, %v1196_v38  ;;  %v1274_v9 = vmul.f32 %v1269_v32, %v1201_v63 }
 0x5a7   : > { %v1270_v31 = vmul.f32 %v1269_v32, %v1181_v59  ;;  %v1275_v52 = vmul.f32 %v1269_v32, %v1206_v29  ;;  %v1276_v61 = vmul.f32 %v1269_v32, %v1211_v17  ;;  %v1277_v0 = vmul.f32 %v1269_v32, %v1216_v36 }
 0x5a8   : > { %1287 = vst [vmem:[%s2148_s6 + $0x8] sm:$0xff] %v1271_v55  ;;  %1288 = vst [vmem:[%s2148_s6 + $0x10] sm:$0xff] %v1272_v58  ;;  %v1278_v3 = vmul.f32 %v1269_v32, %v1221_v37  ;;  %v1279_v6 = vmul.f32 %v1269_v32, %v1226_v62  ;;  %v1280_v53 = vmul.f32 %v1269_v32, %v1231_v23 }
 0x5a9   : > { %1289 = vst [vmem:[%s2148_s6 + $0x18] sm:$0xff] %v1273_v8  ;;  %1290 = vst [vmem:[%s2148_s6 + $0x20] sm:$0xff] %v1274_v9  ;;  %v1281_v10 = vmul.f32 %v1269_v32, %v1236_v43  ;;  %v1282_v54 = vmul.f32 %v1269_v32, %v1241_v2  ;;  %v1283_v11 = vmul.f32 %v1269_v32, %v1246_v26 }
 0x5aa   : > { %v1284_v12 = vmul.f32 %v1269_v32, %v1251_v30  ;;  %v1285_v13 = vmul.f32 %v1269_v32, %v1256_v46  ;;  %1286 = vst [vmem:[%s2148_s6] sm:$0xff] %v1270_v31  ;;  %1291 = vst [vmem:[%s2148_s6 + $0x28] sm:$0xff] %v1275_v52 }
 0x5ab   : > { %1292 = vst [vmem:[%s2148_s6 + $0x30] sm:$0xff] %v1276_v61  ;;  %1293 = vst [vmem:[%s2148_s6 + $0x38] sm:$0xff] %v1277_v0 }
 0x5ac   : > { %1294 = vst [vmem:[%s2148_s6 + $0x40] sm:$0xff] %v1278_v3  ;;  %1295 = vst [vmem:[%s2148_s6 + $0x48] sm:$0xff] %v1279_v6 }
 0x5ad   : > { %1296 = vst [vmem:[%s2148_s6 + $0x50] sm:$0xff] %v1280_v53  ;;  %1297 = vst [vmem:[%s2148_s6 + $0x58] sm:$0xff] %v1281_v10 }
 0x5ae   : > { %1298 = vst [vmem:[%s2148_s6 + $0x60] sm:$0xff] %v1282_v54  ;;  %1299 = vst [vmem:[%s2148_s6 + $0x68] sm:$0xff] %v1283_v11 }
 0x5af   : > { %1300 = vst [vmem:[%s2148_s6 + $0x70] sm:$0xff] %v1284_v12  ;;  %1301 = vst [vmem:[%s2148_s6 + $0x78] sm:$0xff] %v1285_v13 }
 0x5b0   : > { %1849 = shalt.err (!%p1846_p3)
}
 0x5b1   : > { %s1850_s6 = scalar_lea.hbm %s2511_s18, 2048  ;;  %s1854_s5 = scalar_lea.hbm %s2597_s3, 8192 }
 0x5b2   : > { %p1851_p11 = scmp.ne.s32.totalorder %s2511_s18, %s1850_s6  ;;  %p1855_p8 = scmp.lt.u32.totalorder %s2511_s18, %s2597_s3 }
 0x5b3   : > { %p1856_p10 = scmp.lt.u32.totalorder %s1854_s5, %s1850_s6  ;;  %p1858_p7 = scmp.lt.u32.totalorder %s1850_s6, %s2511_s18 }
 0x5b4   : > { %p1852_p13 = pnand %p1851_p11, %p2609_p2 }
 0x5b5   : > { %p1857_p12 = por %p1856_p10, %p1855_p8 }
 0x5b6   : > { %p1853_p5 = pneg %p1852_p13 }
 0x5b7   : > { %p1859_p4 = por %p1858_p7, %p1857_p12 }
 0x5b9   : > { %p1860_p0 = pnand %p1859_p4, %p1853_p5 }
 0x5bb   : > { %1863 = shalt.err (!%p1860_p0)
}
 0x5bc   : > { %s1969_s27 = smov 128   ;;  %s1970_s15 = smov 256  }
 0x5bd   : > { %s1971_s26 = smov 8  }
 0x5be   : > { %1627 = dma.vmem_to_hbm [thread:$0]  (%p2609_p2), %s2517_s23, 2048, %s2511_s18, %s2533_s11, %s1969_s27, %s1970_s15, %s1971_s26  }
 0x5bf PF: > { %p1638_p1 = scmp.ge.s32.totalorder %s1958_s22, 2  ;;  %s1332_s29 = sand.u32 1, %s1918_s12  }
 0x5c0   : > { %p2610_p6 = scmp.ne.s32.totalorder %s2605_s10, 0  ;;  %s1333_s24 = scalar_lea.sflag [#allocation5], %s1332_s29 }
 0x5c2   : > { %p1634_p9 = pnand %p1638_p1, %p2610_p6 }
 0x5c4   : > { %1913 = dma.done.wait (!%p1634_p9), %s1333_s24, 2048  }
 0x5c5   : > { %1915 = vsyncadd (!%p1634_p9), %s1333_s24, 4294965248  ;;  %s19_s22 = sadd.s32 1, %s1958_s22   ;;  %s2611_s7 = sld [smem:[#allocation9_spill]] }
 0x5c6   : > { %p16_p3 = scmp.ge.s32.totalorder %s19_s22, 6   ;;  %s2612_s12 = smov %s1922_s13 }
 0x5c7   : > { %s2613_s13 = smov %s1926_s14  ;;  %s2614_s14 = smov %s2082_s9 }
 0x5c8   : > { %s2615_s15 = smov %s1934_s16  ;;  %s2616_s16 = smov %s1938_s17 }
 0x5c9   : > { %s2617_s17 = smov %s2079_s8  ;;  %s2618_s18 = smov %s1950_s20 }
 0x5ca   : > { %s2619_s19 = smov %s1954_s21  ;;  %s2620_s20 = smov %s2623_s25 }
 0x5cb   : > { %s2621_s21 = smov %s2611_s7  ;;  %18 = sbr.rel (!%p16_p3) target bundleno = 9 (0x9), region = 83 }
 0x5d2   :  { %1338 = vsyncpa [#allocation4], 1 }
 0x5d3   :  { %1340 = vsyncpa [#allocation4 + $0x1], 1 }
 0x5d4   :  { %1341 = vsyncpa [#allocation5], 1 }
 0x5d5   :  { %1343 = vsyncpa [#allocation5 + $0x1], 1 }

</bundles_post_ra>
